<compile_context>
chip_gen: v7x
topology: tpu7x:2x2x1
jax: 0.10.0
libtpu: 0.0.40
codegen_flags: <defaults>
</compile_context>

<pallas_src>
import jax
import jax.numpy as jnp
from jax.experimental import pallas as pl
from jax.experimental.pallas import tpu as pltpu


def _full_spec(shape):
    nd = len(shape)
    return pl.BlockSpec(shape, lambda i, nd=nd: (0,) * nd)


# ---------------------------------------------------------------------------
# Single fused kernel: attention -> GRU step -> fc_id_out + mask_log_softmax
#                      -> argmax / one-hot embedding gather -> tandem_fc
#                      -> fc_rate_out + sigmoid
# ---------------------------------------------------------------------------
def decoder_fused_kernel(
        # data
        hidden_ref,      # [B, H]
        enc_ref,         # [S, B, H]   encoder outputs, native layout
        mask_ref,        # [S, B]      attention mask (transposed once in wrapper)
        emb_ref,         # [B, H]      embedded(input_id)
        rate_ref,        # [B, 1]
        cvec_ref,        # [B, ID]     constraint vector
        rid_ref,         # [B, RID]    road-network static features
        # attention weights (split: hidden part / encoder part)
        wa_h_ref,        # [H, H]
        wa_e_ref,        # [H, H]
        ba_ref,          # [1, H]
        v_ref,           # [1, H]
        # GRU weights stacked per gate [r, z, n] on the leading axis
        wih_w_ref,       # [3, H, H]   weighted-context -> gate
        wih_e_ref,       # [3, H, H]   embedded         -> gate
        wih_r_ref,       # [3, 1, H]   input_rate row   -> gate
        bih_ref,         # [3, 1, H]
        whh_ref,         # [3, H, H]
        bhh_ref,         # [3, 1, H]
        # fc_id_out
        wid_ref,         # [H, ID]
        bid_ref,         # [1, ID]
        # embedding table (for in-kernel id_emb gather via one-hot matmul)
        emb_tbl_ref,     # [ID, H]
        # tandem_fc (split: id_emb part / hidden part)
        wt_id_ref,       # [H, H]
        wt_h_ref,        # [H, H]
        bt_ref,          # [1, H]
        # fc_rate_out (split: tandem part / rid-feature part)
        wr_t_ref,        # [1, H]
        wr_rid_ref,      # [1, RID]
        br_ref,          # [1, 1]
        # outputs
        pred_id_ref,     # [B, ID]
        pred_rate_ref,   # [B, 1]
        hid_out_ref):    # [B, H]
    S, B, H = enc_ref.shape
    ID = emb_tbl_ref.shape[0]

    hidden = hidden_ref[...]             # [B, H]
    enc = enc_ref[...]                   # [S, B, H]
    mask = mask_ref[...]                 # [S, B]

    # ---------------- Attention ----------------
    # energy = tanh([hidden; enc] @ Wa + ba), split into two lane-aligned matmuls.
    h_part = jnp.dot(hidden, wa_h_ref[...], preferred_element_type=jnp.float32)     # [B, H]
    # Collapse (S, B) -> rows for a single 2-D MXU matmul. B == 8 (one sublane
    # tile), so this reshape is layout-preserving (no relayout copy).
    e_part = jnp.dot(enc.reshape(S * B, H), wa_e_ref[...],
                     preferred_element_type=jnp.float32).reshape(S, B, H)            # [S, B, H]
    energy = jnp.tanh(e_part + h_part[None] + ba_ref[...][None])                     # [S, B, H]

    att = jnp.sum(energy * v_ref[...][None], axis=-1)                                # [S, B]
    att = jnp.where(mask == 0.0, -1e6, att)                                          # masked_fill
    att = att - jnp.max(att, axis=0, keepdims=True)
    att_e = jnp.exp(att)
    att = att_e / jnp.sum(att_e, axis=0, keepdims=True)                              # softmax over src_len

    weighted = jnp.sum(att[:, :, None] * enc, axis=0)                                # [B, H]

    # ---------------- GRU single step ----------------
    # rnn_input = [weighted, embedded, input_rate]; per-gate matmuls (no lane slicing)
    emb = emb_ref[...]
    rate = rate_ref[...]                                                             # [B, 1]

    def gi(g):   # input-side pre-activation of gate g
        return (jnp.dot(weighted, wih_w_ref[g], preferred_element_type=jnp.float32)
                + jnp.dot(emb, wih_e_ref[g], preferred_element_type=jnp.float32)
                + rate * wih_r_ref[g]
                + bih_ref[g])

    def gh(g):   # hidden-side pre-activation of gate g
        return jnp.dot(hidden, whh_ref[g], preferred_element_type=jnp.float32) + bhh_ref[g]

    r = jax.nn.sigmoid(gi(0) + gh(0))
    z = jax.nn.sigmoid(gi(1) + gh(1))
    n = jnp.tanh(gi(2) + r * gh(2))
    h_new = (1.0 - z) * n + z * hidden                                               # [B, H]
    hid_out_ref[...] = h_new

    # ---------------- fc_id_out + mask_log_softmax (log_flag=True) ----------------
    logits = jnp.dot(h_new, wid_ref[...], preferred_element_type=jnp.float32) + bid_ref[...]
    maxes = jnp.max(logits, axis=1, keepdims=True)
    x_exp = jnp.exp(logits - maxes) * cvec_ref[...]
    x_sum = jnp.sum(x_exp, axis=1, keepdims=True)
    pred = jnp.clip(x_exp / (x_sum + 1e-6), 1e-6, 1.0)
    pred_log = jnp.log(pred)
    pred_id_ref[...] = pred_log                                                      # [B, ID]

    # ---------------- argmax + id-embedding gather (in-kernel, one-hot matmul) -----
    col = jax.lax.broadcasted_iota(jnp.int32, (B, ID), 1)
    row_max = jnp.max(pred_log, axis=1, keepdims=True)
    # first index of the max (matches torch.argmax tie-breaking)
    first_idx = jnp.min(jnp.where(pred_log == row_max, col, ID), axis=1, keepdims=True)
    one_hot = (col == first_idx).astype(jnp.float32)                                 # [B, ID]
    id_emb = jnp.dot(one_hot, emb_tbl_ref[...], preferred_element_type=jnp.float32)  # [B, H]

    # ---------------- tandem_fc (Linear + ReLU) + fc_rate_out + sigmoid ------------
    t = jnp.maximum(
        jnp.dot(id_emb, wt_id_ref[...], preferred_element_type=jnp.float32)
        + jnp.dot(h_new, wt_h_ref[...], preferred_element_type=jnp.float32)
        + bt_ref[...], 0.0)                                                          # [B, H]
    r_out = (jnp.sum(t * wr_t_ref[...], axis=1, keepdims=True)
             + jnp.sum(rid_ref[...] * wr_rid_ref[...], axis=1, keepdims=True)
             + br_ref[...])
    pred_rate_ref[...] = jax.nn.sigmoid(r_out)                                       # [B, 1]


# ---------------------------------------------------------------------------
# Wrapper
# ---------------------------------------------------------------------------
def decoder_multi_forward(params, input_id, input_rate, hidden, encoder_outputs,
                          attn_mask, constraint_vec, rid_features):
    # All static sizes come from array shapes (never from Python scalars in the
    # jit'd pytree — that was the previous trace failure).
    ID, H = params['emb_id'].shape
    B = input_id.shape[0]

    hidden_b = hidden[0]                                     # [B, H]
    mask_sb = jnp.transpose(attn_mask)                       # [S, B]  (tiny; hoist if looped)
    embedded = params['emb_id'][input_id[:, 0]]              # index_select; dropout = identity
    rate = input_rate.astype(jnp.float32)                    # [B, 1]

    args = (hidden_b, encoder_outputs, mask_sb, embedded, rate,
            constraint_vec, rid_features,
            params['wa_h'], params['wa_e'], params['attn_b'], params['v_w'],
            params['wih_w'], params['wih_e'], params['wih_r'], params['bih_g'],
            params['whh_g'], params['bhh_g'],
            params['w_id'], params['b_id'],
            params['emb_id'],
            params['wt_id'], params['wt_h'], params['tandem_b'],
            params['wr_t'], params['wr_rid'], params['rate_b'])

    pred_id, pred_rate, h_new = pl.pallas_call(
        decoder_fused_kernel,
        grid=(1,),
        in_specs=[_full_spec(a.shape) for a in args],
        out_specs=(_full_spec((B, ID)), _full_spec((B, 1)), _full_spec((B, H))),
        out_shape=(jax.ShapeDtypeStruct((B, ID), jnp.float32),
                   jax.ShapeDtypeStruct((B, 1), jnp.float32),
                   jax.ShapeDtypeStruct((B, H), jnp.float32)),
        input_output_aliases={0: 2},      # hidden in-place -> new hidden
        compiler_params=pltpu.CompilerParams(dimension_semantics=("arbitrary",)),
    )(*args)

    return pred_id, pred_rate, h_new[None, :, :]             # hidden back as [1, B, H]


# ---------------------------------------------------------------------------
# Parameter construction (fused, PyTorch-like) + one-time re-layout
# ---------------------------------------------------------------------------
def make_params(key, H, ID, RID_FEA):
    ks = jax.random.split(key, 14)

    def u(k, shape, scale=0.1):
        return jax.random.uniform(k, shape, jnp.float32, -scale, scale)

    return {
        'emb_id':   u(ks[0], (ID, H)),            # embedding table (id_emb_dim == hid_dim)
        'attn_w':   u(ks[1], (2 * H, H)),         # Attention.attn Linear(2H,H), [in,out]; rows = [hidden; enc]
        'attn_b':   u(ks[2], (1, H)),
        'v_w':      u(ks[3], (1, H)),             # Attention.v Linear(H,1,bias=False), row form
        'w_ih':     u(ks[4], (2 * H + 1, 3 * H)),  # GRU input weights, cols = gates [r|z|n], rows = [weighted; emb; rate]
        'w_hh':     u(ks[5], (H, 3 * H)),
        'b_ih':     u(ks[6], (1, 3 * H)),
        'b_hh':     u(ks[7], (1, 3 * H)),
        'w_id':     u(ks[8], (H, ID)),            # fc_id_out
        'b_id':     u(ks[9], (1, ID)),
        'tandem_w': u(ks[10], (2 * H, H)),        # tandem_fc Linear(2H,H); rows = [id_emb; hidden]
        'tandem_b': u(ks[11], (1, H)),
        'rate_w':   u(ks[12], (1, H + RID_FEA)),  # fc_rate_out Linear(H+rid_fea,1), row form
        'rate_b':   u(ks[13], (1, 1)),
    }


def prepare_params(fused, H):
    """One-time (model-load-time) weight re-layout: split fused matrices into
    per-gate / per-input blocks so the kernel never lane-slices at unaligned
    offsets and never pays in-kernel relayouts."""
    w_ih, w_hh = fused['w_ih'], fused['w_hh']
    b_ih, b_hh = fused['b_ih'], fused['b_hh']
    g3 = range(3)  # gate order [r, z, n]

    p = {k: v for k, v in fused.items()
         if k in ('emb_id', 'attn_b', 'v_w', 'w_id', 'b_id', 'tandem_b', 'rate_b')}
    p['wa_h'] = fused['attn_w'][:H, :]                                             # hidden part
    p['wa_e'] = fused['attn_w'][H:, :]                                             # encoder part
    p['wih_w'] = jnp.stack([w_ih[:H, g * H:(g + 1) * H] for g in g3])              # [3,H,H]
    p['wih_e'] = jnp.stack([w_ih[H:2 * H, g * H:(g + 1) * H] for g in g3])         # [3,H,H]
    p['wih_r'] = jnp.stack([w_ih[2 * H:2 * H + 1, g * H:(g + 1) * H] for g in g3])  # [3,1,H]
    p['bih_g'] = jnp.stack([b_ih[:, g * H:(g + 1) * H] for g in g3])               # [3,1,H]
    p['whh_g'] = jnp.stack([w_hh[:, g * H:(g + 1) * H] for g in g3])               # [3,H,H]
    p['bhh_g'] = jnp.stack([b_hh[:, g * H:(g + 1) * H] for g in g3])               # [3,1,H]
    p['wt_id'] = fused['tandem_w'][:H, :]
    p['wt_h'] = fused['tandem_w'][H:, :]
    p['wr_t'] = fused['rate_w'][:, :H]
    p['wr_rid'] = fused['rate_w'][:, H:]
    return p


# ---------------------------------------------------------------------------
# Deterministic inputs + smoke test
# ---------------------------------------------------------------------------
if __name__ == "__main__":
    B, S, H, ID, RID_FEA = 8, 16, 32, 128, 8

    key = jax.random.PRNGKey(0)
    kp, k1, k2, k3, k4, k5, k6, k7 = jax.random.split(key, 8)
    params = prepare_params(make_params(kp, H, ID, RID_FEA), H)

    input_id = jax.random.randint(k1, (B, 1), 0, ID, dtype=jnp.int32)
    input_rate = jax.random.uniform(k2, (B, 1), jnp.float32)
    hidden = jax.random.normal(k3, (1, B, H), jnp.float32)
    encoder_outputs = jax.random.normal(k4, (S, B, H), jnp.float32)
    lens = jax.random.randint(k5, (B,), S // 2, S + 1)
    attn_mask = (jnp.arange(S)[None, :] < lens[:, None]).astype(jnp.float32)    # [B, S]
    constraint_vec = jax.random.bernoulli(k6, 0.5, (B, ID)).astype(jnp.float32)
    constraint_vec = constraint_vec.at[:, 0].set(1.0)                           # at least one legal id
    rid_features = jax.random.normal(k7, (B, RID_FEA), jnp.float32)

    pred_id, pred_rate, new_hidden = jax.jit(decoder_multi_forward)(
        params, input_id, input_rate, hidden, encoder_outputs,
        attn_mask, constraint_vec, rid_features)

    jax.block_until_ready((pred_id, pred_rate, new_hidden))
    assert pred_id.shape == (B, ID)
    assert pred_rate.shape == (B, 1)
    assert new_hidden.shape == (1, B, H)
    assert bool(jnp.all(jnp.isfinite(pred_id)))
    assert bool(jnp.all((pred_rate >= 0.0) & (pred_rate <= 1.0)))
    print("KERNEL_OK")
</pallas_src>

<mosaic_0001>
module attributes {stable_mosaic.version = 11 : i64} {
  func.func @decoder_fused_kernel(%arg0: i32, %arg1: memref<8x32xf32, #tpu.memory_space<vmem>>, %arg2: memref<16x8x32xf32, #tpu.memory_space<vmem>>, %arg3: memref<16x8xf32, #tpu.memory_space<vmem>>, %arg4: memref<8x32xf32, #tpu.memory_space<vmem>>, %arg5: memref<8x1xf32, #tpu.memory_space<vmem>>, %arg6: memref<8x128xf32, #tpu.memory_space<vmem>>, %arg7: memref<8x8xf32, #tpu.memory_space<vmem>>, %arg8: memref<32x32xf32, #tpu.memory_space<vmem>>, %arg9: memref<32x32xf32, #tpu.memory_space<vmem>>, %arg10: memref<1x32xf32, #tpu.memory_space<vmem>>, %arg11: memref<1x32xf32, #tpu.memory_space<vmem>>, %arg12: memref<3x32x32xf32, #tpu.memory_space<vmem>>, %arg13: memref<3x32x32xf32, #tpu.memory_space<vmem>>, %arg14: memref<3x1x32xf32, #tpu.memory_space<vmem>>, %arg15: memref<3x1x32xf32, #tpu.memory_space<vmem>>, %arg16: memref<3x32x32xf32, #tpu.memory_space<vmem>>, %arg17: memref<3x1x32xf32, #tpu.memory_space<vmem>>, %arg18: memref<32x128xf32, #tpu.memory_space<vmem>>, %arg19: memref<1x128xf32, #tpu.memory_space<vmem>>, %arg20: memref<128x32xf32, #tpu.memory_space<vmem>>, %arg21: memref<32x32xf32, #tpu.memory_space<vmem>>, %arg22: memref<32x32xf32, #tpu.memory_space<vmem>>, %arg23: memref<1x32xf32, #tpu.memory_space<vmem>>, %arg24: memref<1x32xf32, #tpu.memory_space<vmem>>, %arg25: memref<1x8xf32, #tpu.memory_space<vmem>>, %arg26: memref<1x1xf32, #tpu.memory_space<vmem>>, %arg27: memref<8x128xf32, #tpu.memory_space<vmem>>, %arg28: memref<8x1xf32, #tpu.memory_space<vmem>>, %arg29: memref<8x32xf32, #tpu.memory_space<vmem>>) attributes {dimension_semantics = [#tpu.dimension_semantics<arbitrary>], iteration_bounds = array<i64: 1>, scalar_prefetch = 0 : i64, scratch_operands = 0 : i64, tpu.core_type = #tpu.core_type<tc>, window_params = [{pipeline_mode = #tpu.pipeline_mode<synchronous>, transform_indices = @transform_0, window_bounds = array<i64: 8, 32>}, {pipeline_mode = #tpu.pipeline_mode<synchronous>, transform_indices = @transform_1, window_bounds = array<i64: 16, 8, 32>}, {pipeline_mode = #tpu.pipeline_mode<synchronous>, transform_indices = @transform_2, window_bounds = array<i64: 16, 8>}, {pipeline_mode = #tpu.pipeline_mode<synchronous>, transform_indices = @transform_3, window_bounds = array<i64: 8, 32>}, {pipeline_mode = #tpu.pipeline_mode<synchronous>, transform_indices = @transform_4, window_bounds = array<i64: 8, 1>}, {pipeline_mode = #tpu.pipeline_mode<synchronous>, transform_indices = @transform_5, window_bounds = array<i64: 8, 128>}, {pipeline_mode = #tpu.pipeline_mode<synchronous>, transform_indices = @transform_6, window_bounds = array<i64: 8, 8>}, {pipeline_mode = #tpu.pipeline_mode<synchronous>, transform_indices = @transform_7, window_bounds = array<i64: 32, 32>}, {pipeline_mode = #tpu.pipeline_mode<synchronous>, transform_indices = @transform_8, window_bounds = array<i64: 32, 32>}, {pipeline_mode = #tpu.pipeline_mode<synchronous>, transform_indices = @transform_9, window_bounds = array<i64: 1, 32>}, {pipeline_mode = #tpu.pipeline_mode<synchronous>, transform_indices = @transform_10, window_bounds = array<i64: 1, 32>}, {pipeline_mode = #tpu.pipeline_mode<synchronous>, transform_indices = @transform_11, window_bounds = array<i64: 3, 32, 32>}, {pipeline_mode = #tpu.pipeline_mode<synchronous>, transform_indices = @transform_12, window_bounds = array<i64: 3, 32, 32>}, {pipeline_mode = #tpu.pipeline_mode<synchronous>, transform_indices = @transform_13, window_bounds = array<i64: 3, 1, 32>}, {pipeline_mode = #tpu.pipeline_mode<synchronous>, transform_indices = @transform_14, window_bounds = array<i64: 3, 1, 32>}, {pipeline_mode = #tpu.pipeline_mode<synchronous>, transform_indices = @transform_15, window_bounds = array<i64: 3, 32, 32>}, {pipeline_mode = #tpu.pipeline_mode<synchronous>, transform_indices = @transform_16, window_bounds = array<i64: 3, 1, 32>}, {pipeline_mode = #tpu.pipeline_mode<synchronous>, transform_indices = @transform_17, window_bounds = array<i64: 32, 128>}, {pipeline_mode = #tpu.pipeline_mode<synchronous>, transform_indices = @transform_18, window_bounds = array<i64: 1, 128>}, {pipeline_mode = #tpu.pipeline_mode<synchronous>, transform_indices = @transform_19, window_bounds = array<i64: 128, 32>}, {pipeline_mode = #tpu.pipeline_mode<synchronous>, transform_indices = @transform_20, window_bounds = array<i64: 32, 32>}, {pipeline_mode = #tpu.pipeline_mode<synchronous>, transform_indices = @transform_21, window_bounds = array<i64: 32, 32>}, {pipeline_mode = #tpu.pipeline_mode<synchronous>, transform_indices = @transform_22, window_bounds = array<i64: 1, 32>}, {pipeline_mode = #tpu.pipeline_mode<synchronous>, transform_indices = @transform_23, window_bounds = array<i64: 1, 32>}, {pipeline_mode = #tpu.pipeline_mode<synchronous>, transform_indices = @transform_24, window_bounds = array<i64: 1, 8>}, {pipeline_mode = #tpu.pipeline_mode<synchronous>, transform_indices = @transform_25, window_bounds = array<i64: 1, 1>}, {pipeline_mode = #tpu.pipeline_mode<synchronous>, transform_indices = @transform_26, window_bounds = array<i64: 8, 128>}, {pipeline_mode = #tpu.pipeline_mode<synchronous>, transform_indices = @transform_27, window_bounds = array<i64: 8, 1>}, {pipeline_mode = #tpu.pipeline_mode<synchronous>, transform_indices = @transform_28, window_bounds = array<i64: 8, 32>}]} {
    %c0 = arith.constant 0 : index
    %c0_0 = arith.constant 0 : index
    %0 = vector.load %arg1[%c0, %c0_0] : memref<8x32xf32, #tpu.memory_space<vmem>>, vector<8x32xf32>
    %c0_1 = arith.constant 0 : index
    %c0_2 = arith.constant 0 : index
    %c0_3 = arith.constant 0 : index
    %1 = vector.load %arg2[%c0_1, %c0_2, %c0_3] : memref<16x8x32xf32, #tpu.memory_space<vmem>>, vector<16x8x32xf32>
    %c0_4 = arith.constant 0 : index
    %c0_5 = arith.constant 0 : index
    %2 = vector.load %arg3[%c0_4, %c0_5] : memref<16x8xf32, #tpu.memory_space<vmem>>, vector<16x8xf32>
    %c0_6 = arith.constant 0 : index
    %c0_7 = arith.constant 0 : index
    %3 = vector.load %arg8[%c0_6, %c0_7] : memref<32x32xf32, #tpu.memory_space<vmem>>, vector<32x32xf32>
    %cst = arith.constant dense<0.000000e+00> : vector<8x32xf32>
    %4 = tpu.matmul %0, %3, %cst {dimension_numbers = #tpu.dot_dimension_numbers<[1], [0], [0], [1], [0, 0, 1, 1], [], []>} : vector<8x32xf32>, vector<32x32xf32>, vector<8x32xf32> -> vector<8x32xf32>
    %5 = vector.shape_cast %1 : vector<16x8x32xf32> to vector<128x32xf32>
    %c0_8 = arith.constant 0 : index
    %c0_9 = arith.constant 0 : index
    %6 = vector.load %arg9[%c0_8, %c0_9] : memref<32x32xf32, #tpu.memory_space<vmem>>, vector<32x32xf32>
    %cst_10 = arith.constant dense<0.000000e+00> : vector<128x32xf32>
    %7 = tpu.matmul %5, %6, %cst_10 {dimension_numbers = #tpu.dot_dimension_numbers<[1], [0], [0], [1], [0, 0, 1, 1], [], []>} : vector<128x32xf32>, vector<32x32xf32>, vector<128x32xf32> -> vector<128x32xf32>
    %8 = vector.shape_cast %7 : vector<128x32xf32> to vector<16x8x32xf32>
    %9 = vector.shape_cast %4 : vector<8x32xf32> to vector<1x8x32xf32>
    %10 = vector.broadcast %9 : vector<1x8x32xf32> to vector<16x8x32xf32>
    %11 = arith.addf %8, %10 : vector<16x8x32xf32>
    %c0_11 = arith.constant 0 : index
    %c0_12 = arith.constant 0 : index
    %12 = vector.load %arg10[%c0_11, %c0_12] : memref<1x32xf32, #tpu.memory_space<vmem>>, vector<1x32xf32>
    %13 = vector.shape_cast %12 : vector<1x32xf32> to vector<1x1x32xf32>
    %14 = vector.broadcast %13 : vector<1x1x32xf32> to vector<16x8x32xf32>
    %15 = arith.addf %11, %14 : vector<16x8x32xf32>
    %16 = math.tanh %15 : vector<16x8x32xf32>
    %c0_13 = arith.constant 0 : index
    %c0_14 = arith.constant 0 : index
    %17 = vector.load %arg11[%c0_13, %c0_14] : memref<1x32xf32, #tpu.memory_space<vmem>>, vector<1x32xf32>
    %18 = vector.shape_cast %17 : vector<1x32xf32> to vector<1x1x32xf32>
    %19 = vector.broadcast %18 : vector<1x1x32xf32> to vector<16x8x32xf32>
    %20 = arith.mulf %16, %19 : vector<16x8x32xf32>
    %cst_15 = arith.constant dense<0.000000e+00> : vector<16x8xf32>
    %21 = vector.multi_reduction <add>, %20, %cst_15 [2] : vector<16x8x32xf32> to vector<16x8xf32>
    %cst_16 = arith.constant 0.000000e+00 : f32
    %22 = vector.broadcast %cst_16 : f32 to vector<16x8xf32>
    %23 = arith.cmpf oeq, %2, %22 : vector<16x8xf32>
    %cst_17 = arith.constant -1.000000e+06 : f32
    %24 = vector.broadcast %cst_17 : f32 to vector<16x8xf32>
    %25 = arith.select %23, %24, %21 : vector<16x8xi1>, vector<16x8xf32>
    %cst_18 = arith.constant dense<0xFF800000> : vector<8xf32>
    %26 = vector.multi_reduction <maximumf>, %25, %cst_18 [0] : vector<16x8xf32> to vector<8xf32>
    %27 = vector.shape_cast %26 : vector<8xf32> to vector<1x8xf32>
    %28 = vector.broadcast %27 : vector<1x8xf32> to vector<16x8xf32>
    %29 = arith.subf %25, %28 : vector<16x8xf32>
    %30 = math.exp %29 : vector<16x8xf32>
    %cst_19 = arith.constant dense<0.000000e+00> : vector<8xf32>
    %31 = vector.multi_reduction <add>, %30, %cst_19 [0] : vector<16x8xf32> to vector<8xf32>
    %32 = vector.shape_cast %31 : vector<8xf32> to vector<1x8xf32>
    %33 = vector.broadcast %32 : vector<1x8xf32> to vector<16x8xf32>
    %34 = arith.divf %30, %33 : vector<16x8xf32>
    %35 = vector.shape_cast %34 : vector<16x8xf32> to vector<16x8x1xf32>
    %36 = vector.broadcast %35 : vector<16x8x1xf32> to vector<16x8x32xf32>
    %37 = arith.mulf %36, %1 : vector<16x8x32xf32>
    %cst_20 = arith.constant dense<0.000000e+00> : vector<8x32xf32>
    %38 = vector.multi_reduction <add>, %37, %cst_20 [0] : vector<16x8x32xf32> to vector<8x32xf32>
    %c0_21 = arith.constant 0 : index
    %c0_22 = arith.constant 0 : index
    %39 = vector.load %arg4[%c0_21, %c0_22] : memref<8x32xf32, #tpu.memory_space<vmem>>, vector<8x32xf32>
    %c0_23 = arith.constant 0 : index
    %c0_24 = arith.constant 0 : index
    %40 = vector.load %arg5[%c0_23, %c0_24] : memref<8x1xf32, #tpu.memory_space<vmem>>, vector<8x1xf32>
    %c0_25 = arith.constant 0 : index
    %c0_26 = arith.constant 0 : index
    %c0_27 = arith.constant 0 : index
    %41 = vector.load %arg12[%c0_25, %c0_26, %c0_27] : memref<3x32x32xf32, #tpu.memory_space<vmem>>, vector<1x32x32xf32>
    %42 = vector.shape_cast %41 : vector<1x32x32xf32> to vector<32x32xf32>
    %cst_28 = arith.constant dense<0.000000e+00> : vector<8x32xf32>
    %43 = tpu.matmul %38, %42, %cst_28 {dimension_numbers = #tpu.dot_dimension_numbers<[1], [0], [0], [1], [0, 0, 1, 1], [], []>} : vector<8x32xf32>, vector<32x32xf32>, vector<8x32xf32> -> vector<8x32xf32>
    %c0_29 = arith.constant 0 : index
    %c0_30 = arith.constant 0 : index
    %c0_31 = arith.constant 0 : index
    %44 = vector.load %arg13[%c0_29, %c0_30, %c0_31] : memref<3x32x32xf32, #tpu.memory_space<vmem>>, vector<1x32x32xf32>
    %45 = vector.shape_cast %44 : vector<1x32x32xf32> to vector<32x32xf32>
    %cst_32 = arith.constant dense<0.000000e+00> : vector<8x32xf32>
    %46 = tpu.matmul %39, %45, %cst_32 {dimension_numbers = #tpu.dot_dimension_numbers<[1], [0], [0], [1], [0, 0, 1, 1], [], []>} : vector<8x32xf32>, vector<32x32xf32>, vector<8x32xf32> -> vector<8x32xf32>
    %47 = arith.addf %43, %46 : vector<8x32xf32>
    %c0_33 = arith.constant 0 : index
    %c0_34 = arith.constant 0 : index
    %c0_35 = arith.constant 0 : index
    %48 = vector.load %arg14[%c0_33, %c0_34, %c0_35] : memref<3x1x32xf32, #tpu.memory_space<vmem>>, vector<1x1x32xf32>
    %49 = vector.shape_cast %48 : vector<1x1x32xf32> to vector<1x32xf32>
    %50 = vector.broadcast %40 : vector<8x1xf32> to vector<8x32xf32>
    %51 = vector.broadcast %49 : vector<1x32xf32> to vector<8x32xf32>
    %52 = arith.mulf %50, %51 : vector<8x32xf32>
    %53 = arith.addf %47, %52 : vector<8x32xf32>
    %c0_36 = arith.constant 0 : index
    %c0_37 = arith.constant 0 : index
    %c0_38 = arith.constant 0 : index
    %54 = vector.load %arg15[%c0_36, %c0_37, %c0_38] : memref<3x1x32xf32, #tpu.memory_space<vmem>>, vector<1x1x32xf32>
    %55 = vector.shape_cast %54 : vector<1x1x32xf32> to vector<1x32xf32>
    %56 = vector.broadcast %55 : vector<1x32xf32> to vector<8x32xf32>
    %57 = arith.addf %53, %56 : vector<8x32xf32>
    %c0_39 = arith.constant 0 : index
    %c0_40 = arith.constant 0 : index
    %c0_41 = arith.constant 0 : index
    %58 = vector.load %arg16[%c0_39, %c0_40, %c0_41] : memref<3x32x32xf32, #tpu.memory_space<vmem>>, vector<1x32x32xf32>
    %59 = vector.shape_cast %58 : vector<1x32x32xf32> to vector<32x32xf32>
    %cst_42 = arith.constant dense<0.000000e+00> : vector<8x32xf32>
    %60 = tpu.matmul %0, %59, %cst_42 {dimension_numbers = #tpu.dot_dimension_numbers<[1], [0], [0], [1], [0, 0, 1, 1], [], []>} : vector<8x32xf32>, vector<32x32xf32>, vector<8x32xf32> -> vector<8x32xf32>
    %c0_43 = arith.constant 0 : index
    %c0_44 = arith.constant 0 : index
    %c0_45 = arith.constant 0 : index
    %61 = vector.load %arg17[%c0_43, %c0_44, %c0_45] : memref<3x1x32xf32, #tpu.memory_space<vmem>>, vector<1x1x32xf32>
    %62 = vector.shape_cast %61 : vector<1x1x32xf32> to vector<1x32xf32>
    %63 = vector.broadcast %62 : vector<1x32xf32> to vector<8x32xf32>
    %64 = arith.addf %60, %63 : vector<8x32xf32>
    %65 = arith.addf %57, %64 : vector<8x32xf32>
    %66 = arith.negf %65 : vector<8x32xf32>
    %67 = math.exp %66 : vector<8x32xf32>
    %cst_46 = arith.constant 1.000000e+00 : f32
    %68 = vector.broadcast %cst_46 : f32 to vector<8x32xf32>
    %69 = arith.addf %68, %67 : vector<8x32xf32>
    %70 = arith.divf %68, %69 : vector<8x32xf32>
    %c1 = arith.constant 1 : index
    %c0_47 = arith.constant 0 : index
    %c0_48 = arith.constant 0 : index
    %71 = vector.load %arg12[%c1, %c0_47, %c0_48] : memref<3x32x32xf32, #tpu.memory_space<vmem>>, vector<1x32x32xf32>
    %72 = vector.shape_cast %71 : vector<1x32x32xf32> to vector<32x32xf32>
    %cst_49 = arith.constant dense<0.000000e+00> : vector<8x32xf32>
    %73 = tpu.matmul %38, %72, %cst_49 {dimension_numbers = #tpu.dot_dimension_numbers<[1], [0], [0], [1], [0, 0, 1, 1], [], []>} : vector<8x32xf32>, vector<32x32xf32>, vector<8x32xf32> -> vector<8x32xf32>
    %c1_50 = arith.constant 1 : index
    %c0_51 = arith.constant 0 : index
    %c0_52 = arith.constant 0 : index
    %74 = vector.load %arg13[%c1_50, %c0_51, %c0_52] : memref<3x32x32xf32, #tpu.memory_space<vmem>>, vector<1x32x32xf32>
    %75 = vector.shape_cast %74 : vector<1x32x32xf32> to vector<32x32xf32>
    %cst_53 = arith.constant dense<0.000000e+00> : vector<8x32xf32>
    %76 = tpu.matmul %39, %75, %cst_53 {dimension_numbers = #tpu.dot_dimension_numbers<[1], [0], [0], [1], [0, 0, 1, 1], [], []>} : vector<8x32xf32>, vector<32x32xf32>, vector<8x32xf32> -> vector<8x32xf32>
    %77 = arith.addf %73, %76 : vector<8x32xf32>
    %c1_54 = arith.constant 1 : index
    %c0_55 = arith.constant 0 : index
    %c0_56 = arith.constant 0 : index
    %78 = vector.load %arg14[%c1_54, %c0_55, %c0_56] : memref<3x1x32xf32, #tpu.memory_space<vmem>>, vector<1x1x32xf32>
    %79 = vector.shape_cast %78 : vector<1x1x32xf32> to vector<1x32xf32>
    %80 = vector.broadcast %40 : vector<8x1xf32> to vector<8x32xf32>
    %81 = vector.broadcast %79 : vector<1x32xf32> to vector<8x32xf32>
    %82 = arith.mulf %80, %81 : vector<8x32xf32>
    %83 = arith.addf %77, %82 : vector<8x32xf32>
    %c1_57 = arith.constant 1 : index
    %c0_58 = arith.constant 0 : index
    %c0_59 = arith.constant 0 : index
    %84 = vector.load %arg15[%c1_57, %c0_58, %c0_59] : memref<3x1x32xf32, #tpu.memory_space<vmem>>, vector<1x1x32xf32>
    %85 = vector.shape_cast %84 : vector<1x1x32xf32> to vector<1x32xf32>
    %86 = vector.broadcast %85 : vector<1x32xf32> to vector<8x32xf32>
    %87 = arith.addf %83, %86 : vector<8x32xf32>
    %c1_60 = arith.constant 1 : index
    %c0_61 = arith.constant 0 : index
    %c0_62 = arith.constant 0 : index
    %88 = vector.load %arg16[%c1_60, %c0_61, %c0_62] : memref<3x32x32xf32, #tpu.memory_space<vmem>>, vector<1x32x32xf32>
    %89 = vector.shape_cast %88 : vector<1x32x32xf32> to vector<32x32xf32>
    %cst_63 = arith.constant dense<0.000000e+00> : vector<8x32xf32>
    %90 = tpu.matmul %0, %89, %cst_63 {dimension_numbers = #tpu.dot_dimension_numbers<[1], [0], [0], [1], [0, 0, 1, 1], [], []>} : vector<8x32xf32>, vector<32x32xf32>, vector<8x32xf32> -> vector<8x32xf32>
    %c1_64 = arith.constant 1 : index
    %c0_65 = arith.constant 0 : index
    %c0_66 = arith.constant 0 : index
    %91 = vector.load %arg17[%c1_64, %c0_65, %c0_66] : memref<3x1x32xf32, #tpu.memory_space<vmem>>, vector<1x1x32xf32>
    %92 = vector.shape_cast %91 : vector<1x1x32xf32> to vector<1x32xf32>
    %93 = vector.broadcast %92 : vector<1x32xf32> to vector<8x32xf32>
    %94 = arith.addf %90, %93 : vector<8x32xf32>
    %95 = arith.addf %87, %94 : vector<8x32xf32>
    %96 = arith.negf %95 : vector<8x32xf32>
    %97 = math.exp %96 : vector<8x32xf32>
    %cst_67 = arith.constant 1.000000e+00 : f32
    %98 = vector.broadcast %cst_67 : f32 to vector<8x32xf32>
    %99 = arith.addf %98, %97 : vector<8x32xf32>
    %100 = arith.divf %98, %99 : vector<8x32xf32>
    %c2 = arith.constant 2 : index
    %c0_68 = arith.constant 0 : index
    %c0_69 = arith.constant 0 : index
    %101 = vector.load %arg12[%c2, %c0_68, %c0_69] : memref<3x32x32xf32, #tpu.memory_space<vmem>>, vector<1x32x32xf32>
    %102 = vector.shape_cast %101 : vector<1x32x32xf32> to vector<32x32xf32>
    %cst_70 = arith.constant dense<0.000000e+00> : vector<8x32xf32>
    %103 = tpu.matmul %38, %102, %cst_70 {dimension_numbers = #tpu.dot_dimension_numbers<[1], [0], [0], [1], [0, 0, 1, 1], [], []>} : vector<8x32xf32>, vector<32x32xf32>, vector<8x32xf32> -> vector<8x32xf32>
    %c2_71 = arith.constant 2 : index
    %c0_72 = arith.constant 0 : index
    %c0_73 = arith.constant 0 : index
    %104 = vector.load %arg13[%c2_71, %c0_72, %c0_73] : memref<3x32x32xf32, #tpu.memory_space<vmem>>, vector<1x32x32xf32>
    %105 = vector.shape_cast %104 : vector<1x32x32xf32> to vector<32x32xf32>
    %cst_74 = arith.constant dense<0.000000e+00> : vector<8x32xf32>
    %106 = tpu.matmul %39, %105, %cst_74 {dimension_numbers = #tpu.dot_dimension_numbers<[1], [0], [0], [1], [0, 0, 1, 1], [], []>} : vector<8x32xf32>, vector<32x32xf32>, vector<8x32xf32> -> vector<8x32xf32>
    %107 = arith.addf %103, %106 : vector<8x32xf32>
    %c2_75 = arith.constant 2 : index
    %c0_76 = arith.constant 0 : index
    %c0_77 = arith.constant 0 : index
    %108 = vector.load %arg14[%c2_75, %c0_76, %c0_77] : memref<3x1x32xf32, #tpu.memory_space<vmem>>, vector<1x1x32xf32>
    %109 = vector.shape_cast %108 : vector<1x1x32xf32> to vector<1x32xf32>
    %110 = vector.broadcast %40 : vector<8x1xf32> to vector<8x32xf32>
    %111 = vector.broadcast %109 : vector<1x32xf32> to vector<8x32xf32>
    %112 = arith.mulf %110, %111 : vector<8x32xf32>
    %113 = arith.addf %107, %112 : vector<8x32xf32>
    %c2_78 = arith.constant 2 : index
    %c0_79 = arith.constant 0 : index
    %c0_80 = arith.constant 0 : index
    %114 = vector.load %arg15[%c2_78, %c0_79, %c0_80] : memref<3x1x32xf32, #tpu.memory_space<vmem>>, vector<1x1x32xf32>
    %115 = vector.shape_cast %114 : vector<1x1x32xf32> to vector<1x32xf32>
    %116 = vector.broadcast %115 : vector<1x32xf32> to vector<8x32xf32>
    %117 = arith.addf %113, %116 : vector<8x32xf32>
    %c2_81 = arith.constant 2 : index
    %c0_82 = arith.constant 0 : index
    %c0_83 = arith.constant 0 : index
    %118 = vector.load %arg16[%c2_81, %c0_82, %c0_83] : memref<3x32x32xf32, #tpu.memory_space<vmem>>, vector<1x32x32xf32>
    %119 = vector.shape_cast %118 : vector<1x32x32xf32> to vector<32x32xf32>
    %cst_84 = arith.constant dense<0.000000e+00> : vector<8x32xf32>
    %120 = tpu.matmul %0, %119, %cst_84 {dimension_numbers = #tpu.dot_dimension_numbers<[1], [0], [0], [1], [0, 0, 1, 1], [], []>} : vector<8x32xf32>, vector<32x32xf32>, vector<8x32xf32> -> vector<8x32xf32>
    %c2_85 = arith.constant 2 : index
    %c0_86 = arith.constant 0 : index
    %c0_87 = arith.constant 0 : index
    %121 = vector.load %arg17[%c2_85, %c0_86, %c0_87] : memref<3x1x32xf32, #tpu.memory_space<vmem>>, vector<1x1x32xf32>
    %122 = vector.shape_cast %121 : vector<1x1x32xf32> to vector<1x32xf32>
    %123 = vector.broadcast %122 : vector<1x32xf32> to vector<8x32xf32>
    %124 = arith.addf %120, %123 : vector<8x32xf32>
    %125 = arith.mulf %70, %124 : vector<8x32xf32>
    %126 = arith.addf %117, %125 : vector<8x32xf32>
    %127 = math.tanh %126 : vector<8x32xf32>
    %cst_88 = arith.constant 1.000000e+00 : f32
    %128 = vector.broadcast %cst_88 : f32 to vector<8x32xf32>
    %129 = arith.subf %128, %100 : vector<8x32xf32>
    %130 = arith.mulf %129, %127 : vector<8x32xf32>
    %131 = arith.mulf %100, %0 : vector<8x32xf32>
    %132 = arith.addf %130, %131 : vector<8x32xf32>
    %c0_89 = arith.constant 0 : index
    %c0_90 = arith.constant 0 : index
    %133 = vector.load %arg29[%c0_89, %c0_90] : memref<8x32xf32, #tpu.memory_space<vmem>>, vector<8x32xf32>
    tpu.vector_store %arg29[%c0_89, %c0_90], %132 {strides = array<i32>} : memref<8x32xf32, #tpu.memory_space<vmem>>, vector<8x32xf32>,
    %c0_91 = arith.constant 0 : index
    %c0_92 = arith.constant 0 : index
    %134 = vector.load %arg18[%c0_91, %c0_92] : memref<32x128xf32, #tpu.memory_space<vmem>>, vector<32x128xf32>
    %cst_93 = arith.constant dense<0.000000e+00> : vector<8x128xf32>
    %135 = tpu.matmul %132, %134, %cst_93 {dimension_numbers = #tpu.dot_dimension_numbers<[1], [0], [0], [1], [0, 0, 1, 1], [], []>} : vector<8x32xf32>, vector<32x128xf32>, vector<8x128xf32> -> vector<8x128xf32>
    %c0_94 = arith.constant 0 : index
    %c0_95 = arith.constant 0 : index
    %136 = vector.load %arg19[%c0_94, %c0_95] : memref<1x128xf32, #tpu.memory_space<vmem>>, vector<1x128xf32>
    %137 = vector.broadcast %136 : vector<1x128xf32> to vector<8x128xf32>
    %138 = arith.addf %135, %137 : vector<8x128xf32>
    %cst_96 = arith.constant dense<0xFF800000> : vector<8xf32>
    %139 = vector.multi_reduction <maximumf>, %138, %cst_96 [1] : vector<8x128xf32> to vector<8xf32>
    %140 = vector.shape_cast %139 : vector<8xf32> to vector<8x1xf32>
    %141 = vector.broadcast %140 : vector<8x1xf32> to vector<8x128xf32>
    %142 = arith.subf %138, %141 : vector<8x128xf32>
    %143 = math.exp %142 : vector<8x128xf32>
    %c0_97 = arith.constant 0 : index
    %c0_98 = arith.constant 0 : index
    %144 = vector.load %arg6[%c0_97, %c0_98] : memref<8x128xf32, #tpu.memory_space<vmem>>, vector<8x128xf32>
    %145 = arith.mulf %143, %144 : vector<8x128xf32>
    %cst_99 = arith.constant dense<0.000000e+00> : vector<8xf32>
    %146 = vector.multi_reduction <add>, %145, %cst_99 [1] : vector<8x128xf32> to vector<8xf32>
    %147 = vector.shape_cast %146 : vector<8xf32> to vector<8x1xf32>
    %cst_100 = arith.constant 9.99999997E-7 : f32
    %148 = vector.broadcast %cst_100 : f32 to vector<8x1xf32>
    %149 = arith.addf %147, %148 : vector<8x1xf32>
    %150 = vector.broadcast %149 : vector<8x1xf32> to vector<8x128xf32>
    %151 = arith.divf %145, %150 : vector<8x128xf32>
    %cst_101 = arith.constant 9.99999997E-7 : f32
    %cst_102 = arith.constant 1.000000e+00 : f32
    %152 = vector.broadcast %cst_101 : f32 to vector<8x128xf32>
    %153 = arith.maximumf %152, %151 : vector<8x128xf32>
    %154 = vector.broadcast %cst_102 : f32 to vector<8x128xf32>
    %155 = arith.minimumf %154, %153 : vector<8x128xf32>
    %156 = math.log %155 : vector<8x128xf32>
    %c0_103 = arith.constant 0 : index
    %c0_104 = arith.constant 0 : index
    %157 = vector.load %arg27[%c0_103, %c0_104] : memref<8x128xf32, #tpu.memory_space<vmem>>, vector<8x128xf32>
    tpu.vector_store %arg27[%c0_103, %c0_104], %156 {strides = array<i32>} : memref<8x128xf32, #tpu.memory_space<vmem>>, vector<8x128xf32>,
    %158 = tpu.iota {dimensions = array<i32: 1>} : vector<8x128xi32>
    %cst_105 = arith.constant dense<0xFF800000> : vector<8xf32>
    %159 = vector.multi_reduction <maximumf>, %156, %cst_105 [1] : vector<8x128xf32> to vector<8xf32>
    %160 = vector.shape_cast %159 : vector<8xf32> to vector<8x1xf32>
    %161 = vector.broadcast %160 : vector<8x1xf32> to vector<8x128xf32>
    %162 = arith.cmpf oeq, %156, %161 : vector<8x128xf32>
    %c128_i32 = arith.constant 128 : i32
    %163 = vector.broadcast %c128_i32 : i32 to vector<8x128xi32>
    %164 = arith.select %162, %158, %163 : vector<8x128xi1>, vector<8x128xi32>
    %cst_106 = arith.constant dense<2147483647> : vector<8xi32>
    %165 = vector.multi_reduction <minsi>, %164, %cst_106 [1] : vector<8x128xi32> to vector<8xi32>
    %166 = vector.shape_cast %165 : vector<8xi32> to vector<8x1xi32>
    %167 = vector.broadcast %166 : vector<8x1xi32> to vector<8x128xi32>
    %168 = arith.cmpi eq, %158, %167 : vector<8x128xi32>
    %169 = arith.extui %168 : vector<8x128xi1> to vector<8x128xi32>
    %170 = arith.sitofp %169 : vector<8x128xi32> to vector<8x128xf32>
    %c0_107 = arith.constant 0 : index
    %c0_108 = arith.constant 0 : index
    %171 = vector.load %arg20[%c0_107, %c0_108] : memref<128x32xf32, #tpu.memory_space<vmem>>, vector<128x32xf32>
    %cst_109 = arith.constant dense<0.000000e+00> : vector<8x32xf32>
    %172 = tpu.matmul %170, %171, %cst_109 {dimension_numbers = #tpu.dot_dimension_numbers<[1], [0], [0], [1], [0, 0, 1, 1], [], []>} : vector<8x128xf32>, vector<128x32xf32>, vector<8x32xf32> -> vector<8x32xf32>
    %c0_110 = arith.constant 0 : index
    %c0_111 = arith.constant 0 : index
    %173 = vector.load %arg21[%c0_110, %c0_111] : memref<32x32xf32, #tpu.memory_space<vmem>>, vector<32x32xf32>
    %cst_112 = arith.constant dense<0.000000e+00> : vector<8x32xf32>
    %174 = tpu.matmul %172, %173, %cst_112 {dimension_numbers = #tpu.dot_dimension_numbers<[1], [0], [0], [1], [0, 0, 1, 1], [], []>} : vector<8x32xf32>, vector<32x32xf32>, vector<8x32xf32> -> vector<8x32xf32>
    %c0_113 = arith.constant 0 : index
    %c0_114 = arith.constant 0 : index
    %175 = vector.load %arg22[%c0_113, %c0_114] : memref<32x32xf32, #tpu.memory_space<vmem>>, vector<32x32xf32>
    %cst_115 = arith.constant dense<0.000000e+00> : vector<8x32xf32>
    %176 = tpu.matmul %132, %175, %cst_115 {dimension_numbers = #tpu.dot_dimension_numbers<[1], [0], [0], [1], [0, 0, 1, 1], [], []>} : vector<8x32xf32>, vector<32x32xf32>, vector<8x32xf32> -> vector<8x32xf32>
    %177 = arith.addf %174, %176 : vector<8x32xf32>
    %c0_116 = arith.constant 0 : index
    %c0_117 = arith.constant 0 : index
    %178 = vector.load %arg23[%c0_116, %c0_117] : memref<1x32xf32, #tpu.memory_space<vmem>>, vector<1x32xf32>
    %179 = vector.broadcast %178 : vector<1x32xf32> to vector<8x32xf32>
    %180 = arith.addf %177, %179 : vector<8x32xf32>
    %cst_118 = arith.constant 0.000000e+00 : f32
    %181 = vector.broadcast %cst_118 : f32 to vector<8x32xf32>
    %182 = arith.maximumf %180, %181 : vector<8x32xf32>
    %c0_119 = arith.constant 0 : index
    %c0_120 = arith.constant 0 : index
    %183 = vector.load %arg24[%c0_119, %c0_120] : memref<1x32xf32, #tpu.memory_space<vmem>>, vector<1x32xf32>
    %184 = vector.broadcast %183 : vector<1x32xf32> to vector<8x32xf32>
    %185 = arith.mulf %182, %184 : vector<8x32xf32>
    %cst_121 = arith.constant dense<0.000000e+00> : vector<8xf32>
    %186 = vector.multi_reduction <add>, %185, %cst_121 [1] : vector<8x32xf32> to vector<8xf32>
    %187 = vector.shape_cast %186 : vector<8xf32> to vector<8x1xf32>
    %c0_122 = arith.constant 0 : index
    %c0_123 = arith.constant 0 : index
    %188 = vector.load %arg7[%c0_122, %c0_123] : memref<8x8xf32, #tpu.memory_space<vmem>>, vector<8x8xf32>
    %c0_124 = arith.constant 0 : index
    %c0_125 = arith.constant 0 : index
    %189 = vector.load %arg25[%c0_124, %c0_125] : memref<1x8xf32, #tpu.memory_space<vmem>>, vector<1x8xf32>
    %190 = vector.broadcast %189 : vector<1x8xf32> to vector<8x8xf32>
    %191 = arith.mulf %188, %190 : vector<8x8xf32>
    %cst_126 = arith.constant dense<0.000000e+00> : vector<8xf32>
    %192 = vector.multi_reduction <add>, %191, %cst_126 [1] : vector<8x8xf32> to vector<8xf32>
    %193 = vector.shape_cast %192 : vector<8xf32> to vector<8x1xf32>
    %194 = arith.addf %187, %193 : vector<8x1xf32>
    %c0_127 = arith.constant 0 : index
    %c0_128 = arith.constant 0 : index
    %195 = vector.load %arg26[%c0_127, %c0_128] : memref<1x1xf32, #tpu.memory_space<vmem>>, vector<1x1xf32>
    %196 = vector.broadcast %195 : vector<1x1xf32> to vector<8x1xf32>
    %197 = arith.addf %194, %196 : vector<8x1xf32>
    %198 = arith.negf %197 : vector<8x1xf32>
    %199 = math.exp %198 : vector<8x1xf32>
    %cst_129 = arith.constant 1.000000e+00 : f32
    %200 = vector.broadcast %cst_129 : f32 to vector<8x1xf32>
    %201 = arith.addf %200, %199 : vector<8x1xf32>
    %202 = arith.divf %200, %201 : vector<8x1xf32>
    %c0_130 = arith.constant 0 : index
    %c0_131 = arith.constant 0 : index
    %203 = vector.load %arg28[%c0_130, %c0_131] : memref<8x1xf32, #tpu.memory_space<vmem>>, vector<8x1xf32>
    tpu.vector_store %arg28[%c0_130, %c0_131], %202 {strides = array<i32>} : memref<8x1xf32, #tpu.memory_space<vmem>>, vector<8x1xf32>,
    return
  }
  func.func @transform_0(%arg0: i32) -> (i32, i32) {
    %c0_i32 = arith.constant 0 : i32
    %c0_i32_0 = arith.constant 0 : i32
    %c0_i32_1 = arith.constant 0 : i32
    return %c0_i32, %c0_i32_0 : i32, i32
  }
  func.func @transform_1(%arg0: i32) -> (i32, i32, i32) {
    %c0_i32 = arith.constant 0 : i32
    %c0_i32_0 = arith.constant 0 : i32
    %c0_i32_1 = arith.constant 0 : i32
    %c0_i32_2 = arith.constant 0 : i32
    return %c0_i32, %c0_i32_0, %c0_i32_1 : i32, i32, i32
  }
  func.func @transform_2(%arg0: i32) -> (i32, i32) {
    %c0_i32 = arith.constant 0 : i32
    %c0_i32_0 = arith.constant 0 : i32
    %c0_i32_1 = arith.constant 0 : i32
    return %c0_i32, %c0_i32_0 : i32, i32
  }
  func.func @transform_3(%arg0: i32) -> (i32, i32) {
    %c0_i32 = arith.constant 0 : i32
    %c0_i32_0 = arith.constant 0 : i32
    %c0_i32_1 = arith.constant 0 : i32
    return %c0_i32, %c0_i32_0 : i32, i32
  }
  func.func @transform_4(%arg0: i32) -> (i32, i32) {
    %c0_i32 = arith.constant 0 : i32
    %c0_i32_0 = arith.constant 0 : i32
    %c0_i32_1 = arith.constant 0 : i32
    return %c0_i32, %c0_i32_0 : i32, i32
  }
  func.func @transform_5(%arg0: i32) -> (i32, i32) {
    %c0_i32 = arith.constant 0 : i32
    %c0_i32_0 = arith.constant 0 : i32
    %c0_i32_1 = arith.constant 0 : i32
    return %c0_i32, %c0_i32_0 : i32, i32
  }
  func.func @transform_6(%arg0: i32) -> (i32, i32) {
    %c0_i32 = arith.constant 0 : i32
    %c0_i32_0 = arith.constant 0 : i32
    %c0_i32_1 = arith.constant 0 : i32
    return %c0_i32, %c0_i32_0 : i32, i32
  }
  func.func @transform_7(%arg0: i32) -> (i32, i32) {
    %c0_i32 = arith.constant 0 : i32
    %c0_i32_0 = arith.constant 0 : i32
    %c0_i32_1 = arith.constant 0 : i32
    return %c0_i32, %c0_i32_0 : i32, i32
  }
  func.func @transform_8(%arg0: i32) -> (i32, i32) {
    %c0_i32 = arith.constant 0 : i32
    %c0_i32_0 = arith.constant 0 : i32
    %c0_i32_1 = arith.constant 0 : i32
    return %c0_i32, %c0_i32_0 : i32, i32
  }
  func.func @transform_9(%arg0: i32) -> (i32, i32) {
    %c0_i32 = arith.constant 0 : i32
    %c0_i32_0 = arith.constant 0 : i32
    %c0_i32_1 = arith.constant 0 : i32
    return %c0_i32, %c0_i32_0 : i32, i32
  }
  func.func @transform_10(%arg0: i32) -> (i32, i32) {
    %c0_i32 = arith.constant 0 : i32
    %c0_i32_0 = arith.constant 0 : i32
    %c0_i32_1 = arith.constant 0 : i32
    return %c0_i32, %c0_i32_0 : i32, i32
  }
  func.func @transform_11(%arg0: i32) -> (i32, i32, i32) {
    %c0_i32 = arith.constant 0 : i32
    %c0_i32_0 = arith.constant 0 : i32
    %c0_i32_1 = arith.constant 0 : i32
    %c0_i32_2 = arith.constant 0 : i32
    return %c0_i32, %c0_i32_0, %c0_i32_1 : i32, i32, i32
  }
  func.func @transform_12(%arg0: i32) -> (i32, i32, i32) {
    %c0_i32 = arith.constant 0 : i32
    %c0_i32_0 = arith.constant 0 : i32
    %c0_i32_1 = arith.constant 0 : i32
    %c0_i32_2 = arith.constant 0 : i32
    return %c0_i32, %c0_i32_0, %c0_i32_1 : i32, i32, i32
  }
  func.func @transform_13(%arg0: i32) -> (i32, i32, i32) {
    %c0_i32 = arith.constant 0 : i32
    %c0_i32_0 = arith.constant 0 : i32
    %c0_i32_1 = arith.constant 0 : i32
    %c0_i32_2 = arith.constant 0 : i32
    return %c0_i32, %c0_i32_0, %c0_i32_1 : i32, i32, i32
  }
  func.func @transform_14(%arg0: i32) -> (i32, i32, i32) {
    %c0_i32 = arith.constant 0 : i32
    %c0_i32_0 = arith.constant 0 : i32
    %c0_i32_1 = arith.constant 0 : i32
    %c0_i32_2 = arith.constant 0 : i32
    return %c0_i32, %c0_i32_0, %c0_i32_1 : i32, i32, i32
  }
  func.func @transform_15(%arg0: i32) -> (i32, i32, i32) {
    %c0_i32 = arith.constant 0 : i32
    %c0_i32_0 = arith.constant 0 : i32
    %c0_i32_1 = arith.constant 0 : i32
    %c0_i32_2 = arith.constant 0 : i32
    return %c0_i32, %c0_i32_0, %c0_i32_1 : i32, i32, i32
  }
  func.func @transform_16(%arg0: i32) -> (i32, i32, i32) {
    %c0_i32 = arith.constant 0 : i32
    %c0_i32_0 = arith.constant 0 : i32
    %c0_i32_1 = arith.constant 0 : i32
    %c0_i32_2 = arith.constant 0 : i32
    return %c0_i32, %c0_i32_0, %c0_i32_1 : i32, i32, i32
  }
  func.func @transform_17(%arg0: i32) -> (i32, i32) {
    %c0_i32 = arith.constant 0 : i32
    %c0_i32_0 = arith.constant 0 : i32
    %c0_i32_1 = arith.constant 0 : i32
    return %c0_i32, %c0_i32_0 : i32, i32
  }
  func.func @transform_18(%arg0: i32) -> (i32, i32) {
    %c0_i32 = arith.constant 0 : i32
    %c0_i32_0 = arith.constant 0 : i32
    %c0_i32_1 = arith.constant 0 : i32
    return %c0_i32, %c0_i32_0 : i32, i32
  }
  func.func @transform_19(%arg0: i32) -> (i32, i32) {
    %c0_i32 = arith.constant 0 : i32
    %c0_i32_0 = arith.constant 0 : i32
    %c0_i32_1 = arith.constant 0 : i32
    return %c0_i32, %c0_i32_0 : i32, i32
  }
  func.func @transform_20(%arg0: i32) -> (i32, i32) {
    %c0_i32 = arith.constant 0 : i32
    %c0_i32_0 = arith.constant 0 : i32
    %c0_i32_1 = arith.constant 0 : i32
    return %c0_i32, %c0_i32_0 : i32, i32
  }
  func.func @transform_21(%arg0: i32) -> (i32, i32) {
    %c0_i32 = arith.constant 0 : i32
    %c0_i32_0 = arith.constant 0 : i32
    %c0_i32_1 = arith.constant 0 : i32
    return %c0_i32, %c0_i32_0 : i32, i32
  }
  func.func @transform_22(%arg0: i32) -> (i32, i32) {
    %c0_i32 = arith.constant 0 : i32
    %c0_i32_0 = arith.constant 0 : i32
    %c0_i32_1 = arith.constant 0 : i32
    return %c0_i32, %c0_i32_0 : i32, i32
  }
  func.func @transform_23(%arg0: i32) -> (i32, i32) {
    %c0_i32 = arith.constant 0 : i32
    %c0_i32_0 = arith.constant 0 : i32
    %c0_i32_1 = arith.constant 0 : i32
    return %c0_i32, %c0_i32_0 : i32, i32
  }
  func.func @transform_24(%arg0: i32) -> (i32, i32) {
    %c0_i32 = arith.constant 0 : i32
    %c0_i32_0 = arith.constant 0 : i32
    %c0_i32_1 = arith.constant 0 : i32
    return %c0_i32, %c0_i32_0 : i32, i32
  }
  func.func @transform_25(%arg0: i32) -> (i32, i32) {
    %c0_i32 = arith.constant 0 : i32
    %c0_i32_0 = arith.constant 0 : i32
    %c0_i32_1 = arith.constant 0 : i32
    return %c0_i32, %c0_i32_0 : i32, i32
  }
  func.func @transform_26(%arg0: i32) -> (i32, i32) {
    %c0_i32 = arith.constant 0 : i32
    %c0_i32_0 = arith.constant 0 : i32
    %c0_i32_1 = arith.constant 0 : i32
    return %c0_i32, %c0_i32_0 : i32, i32
  }
  func.func @transform_27(%arg0: i32) -> (i32, i32) {
    %c0_i32 = arith.constant 0 : i32
    %c0_i32_0 = arith.constant 0 : i32
    %c0_i32_1 = arith.constant 0 : i32
    return %c0_i32, %c0_i32_0 : i32, i32
  }
  func.func @transform_28(%arg0: i32) -> (i32, i32) {
    %c0_i32 = arith.constant 0 : i32
    %c0_i32_0 = arith.constant 0 : i32
    %c0_i32_1 = arith.constant 0 : i32
    return %c0_i32, %c0_i32_0 : i32, i32
  }
}

</mosaic_0001>

<bundles_post_ra>
// kernel: decoder_multi_forward.1
= control target key start
LH: loop header
LB: loop body
LE: loop exit
PB: predicated region body
PF: predicated region fallthrough
CT: control target
= control target key end

     0   :  { %s3845_s0 = inlined_call_operand.vmem [shape: f32[8,32], index: 0, kind: input, shape index: {}, may-alias: {0,28}]   ;;  %s3846_s1 = inlined_call_operand.vmem [shape: f32[16,8,32], index: 1, kind: input, shape index: {}]   ;;  %s3847_s2 = inlined_call_operand.vmem [shape: f32[16,8], index: 2, kind: input, shape index: {}]   ;;  %s3848_s3 = inlined_call_operand.vmem [shape: f32[8,32], index: 3, kind: input, shape index: {}]   ;;  %s3849_s4 = inlined_call_operand.vmem [shape: f32[8,1], index: 4, kind: input, shape index: {}]   ;;  %s3850_s5 = inlined_call_operand.hbm [shape: f32[8,128], index: 5, kind: input, shape index: {}]   ;;  %s3851_s6 = inlined_call_operand.hbm [shape: f32[8,8], index: 6, kind: input, shape index: {}]   ;;  %s3852_s7 = inlined_call_operand.hbm [shape: f32[32,32], index: 7, kind: input, shape index: {}]   ;;  %s3853_s8 = inlined_call_operand.hbm [shape: f32[32,32], index: 8, kind: input, shape index: {}]   ;;  %s3854_s9 = inlined_call_operand.vmem [shape: f32[1,32], index: 9, kind: input, shape index: {}]   ;;  %s3855_s10 = inlined_call_operand.vmem [shape: f32[1,32], index: 10, kind: input, shape index: {}]   ;;  %s3856_s11 = inlined_call_operand.vmem [shape: f32[3,32,32], index: 11, kind: input, shape index: {}]   ;;  %s3857_s12 = inlined_call_operand.vmem [shape: f32[3,32,32], index: 12, kind: input, shape index: {}]   ;;  %s3858_s13 = inlined_call_operand.vmem [shape: f32[3,1,32], index: 13, kind: input, shape index: {}]   ;;  %s3859_s14 = inlined_call_operand.vmem [shape: f32[3,1,32], index: 14, kind: input, shape index: {}]   ;;  %s3860_s15 = inlined_call_operand.hbm [shape: f32[3,32,32], index: 15, kind: input, shape index: {}]   ;;  %s3861_s16 = inlined_call_operand.vmem [shape: f32[3,1,32], index: 16, kind: input, shape index: {}]   ;;  %s3862_s17 = inlined_call_operand.hbm [shape: f32[32,128], index: 17, kind: input, shape index: {}]   ;;  %s3863_s18 = inlined_call_operand.vmem [shape: f32[1,128], index: 18, kind: input, shape index: {}]   ;;  %s3864_s19 = inlined_call_operand.vmem [shape: f32[128,32], index: 19, kind: input, shape index: {}]   ;;  %s3865_s20 = inlined_call_operand.hbm [shape: f32[32,32], index: 20, kind: input, shape index: {}]   ;;  %s3866_s21 = inlined_call_operand.hbm [shape: f32[32,32], index: 21, kind: input, shape index: {}]   ;;  %s3867_s22 = inlined_call_operand.vmem [shape: f32[1,32], index: 22, kind: input, shape index: {}]   ;;  %s3868_s23 = inlined_call_operand.hbm [shape: f32[1,32], index: 23, kind: input, shape index: {}]   ;;  %s3869_s24 = inlined_call_operand.hbm [shape: f32[1,8], index: 24, kind: input, shape index: {}]   ;;  %s3870_s25 = inlined_call_operand.<no memory space> [shape: f32[1,1], index: 25, kind: input, shape index: {}]   ;;  %s3871_s26 = inlined_call_operand.hbm [shape: f32[8,128], index: 26, kind: output, shape index: {0}]   ;;  %s3872_s27 = inlined_call_operand.vmem [shape: f32[8,1], index: 27, kind: output, shape index: {1}]   ;;  %s3873_s28 = inlined_call_operand.vmem [shape: f32[8,32], index: 28, kind: output, shape index: {2}, may-alias: {0,28}]  }
   0x1   :  { %3883 = sst [smem:[#allocation28_spill]] %s3845_s0  ;;  %v34_v0 = vstv %s3870_s25 }
   0x2   :  { %3884 = sst [smem:[#allocation29_spill]] %s3846_s1  ;;  %35 = vst [vmem:[#allocation2] sm:$0x1] %v34_v0 }
   0x3   :  { %3885 = sst [smem:[#allocation30_spill]] %s3847_s2 }
   0x4   :  { %3886 = sst [smem:[#allocation31_spill]] %s3848_s3 }
   0x5   :  { %3887 = sst [smem:[#allocation32_spill]] %s3849_s4 }
   0x6   :  { %3888 = sst [smem:[#allocation33_spill]] %s3850_s5 }
   0x7   :  { %3889 = sst [smem:[#allocation34_spill]] %s3851_s6 }
   0x8   :  { %3890 = sst [smem:[#allocation35_spill]] %s3852_s7 }
   0x9   :  { %3891 = sst [smem:[#allocation36_spill]] %s3853_s8 }
   0xa   :  { %3892 = sst [smem:[#allocation37_spill]] %s3854_s9 }
   0xb   :  { %3893 = sst [smem:[#allocation38_spill]] %s3855_s10 }
   0xc   :  { %3894 = sst [smem:[#allocation39_spill]] %s3856_s11 }
   0xd   :  { %3895 = sst [smem:[#allocation40_spill]] %s3857_s12 }
   0xe   :  { %36 = vsyncpa [#allocation4], 0 }
   0xf   :  { %37 = vsyncpa [#allocation7], 0 }
  0x10   :  { %38 = vsyncpa [#allocation10], 0 }
  0x11   :  { %39 = vsyncpa [#allocation13], 0 }
  0x12   :  { %40 = vsyncpa [#allocation16], 0 }
  0x13   :  { %41 = vsyncpa [#allocation19], 0 }
  0x14   :  { %42 = vsyncpa [#allocation5], 0  ;;  %s2996_s9 = smov [#allocation6]   ;;  %s3896_s10 = sld [smem:[#allocation34_spill]] }
  0x15   :  { %s69_s30 = sshll.u32 %s2996_s9, 4  ;;  %s70_s30 = int_to_ptr.vmem [resolvable:$true] %s69_s30 }
  0x1a   :  { %s2740_s0 = scalar_lea.hbm %s3896_s10, 128 }
  0x1b   :  { %p2741_p0 = scmp.ne.s32.totalorder %s3896_s10, %s2740_s0  ;;  %p2744_p1 = scmp.lt.u32.totalorder %s2740_s0, %s3896_s10 }
  0x1d   :  { %p2746_p2 = pnand %p2744_p1, %p2741_p0 }
  0x1f   :  { %2749 = shalt.err (!%p2746_p2)
}
  0x20   :  { %s2750_s7 = scalar_lea.vmem %s70_s30, 128  ;;  %p2755_p4 = scmp.lt.s32.totalorder %s70_s30, %s70_s30 }
  0x21   :  { %p2751_p3 = scmp.ne.s32.totalorder %s70_s30, %s2750_s7  ;;  %p2756_p5 = scmp.lt.s32.totalorder %s2750_s7, %s2750_s7 }
  0x23   :  { %p2757_p6 = por %p2756_p5, %p2755_p4 }
  0x25   :  { %p2758_p7 = pnand %p2757_p6, %p2751_p3 }
  0x27   :  { %2761 = shalt.err (!%p2758_p7)
}
  0x28   :  { %72 = dma.hbm_to_vmem [thread:$0]  %s3896_s10, 128, %s70_s30, [#allocation7]  }
  0x29   :  { %s2997_s4 = smov [#allocation9]   ;;  %s2998_s5 = smov [#allocation12]  }
  0x2a   :  { %s90_s8 = sshll.u32 %s2997_s4, 4  ;;  %s128_s9 = sshll.u32 %s2998_s5, 4  ;;  %s91_s8 = int_to_ptr.vmem [resolvable:$true] %s90_s8  ;;  %s129_s9 = int_to_ptr.vmem [resolvable:$true] %s128_s9 }
  0x2b   :  { %s3897_s0 = sld [smem:[#allocation36_spill]] }
  0x31   :  { %s2762_s11 = scalar_lea.hbm %s3897_s0, 512 }
  0x32   :  { %p2763_p8 = scmp.ne.s32.totalorder %s3897_s0, %s2762_s11  ;;  %p2766_p9 = scmp.lt.u32.totalorder %s2762_s11, %s3897_s0 }
  0x34   :  { %p2768_p10 = pnand %p2766_p9, %p2763_p8 }
  0x36   :  { %2771 = shalt.err (!%p2768_p10)
}
  0x37   :  { %s2772_s30 = scalar_lea.vmem %s91_s8, 512  ;;  %p2777_p12 = scmp.lt.s32.totalorder %s91_s8, %s91_s8 }
  0x38   :  { %p2773_p11 = scmp.ne.s32.totalorder %s91_s8, %s2772_s30  ;;  %p2778_p13 = scmp.lt.s32.totalorder %s2772_s30, %s2772_s30 }
  0x3a   :  { %p2779_p0 = por %p2778_p13, %p2777_p12 }
  0x3c   :  { %p2780_p1 = pnand %p2779_p0, %p2773_p11 }
  0x3e   :  { %2783 = shalt.err (!%p2780_p1)
}
  0x3f   :  { %s2999_s10 = smov 128   ;;  %s3000_s12 = smov 8  }
  0x40   :  { %96 = dma.hbm_to_vmem [thread:$0]  %s3897_s0, 512, %s91_s8, [#allocation10], %s2999_s10, %s2999_s10, %s3000_s12  }
  0x41   :  { %s2784_s6 = scalar_lea.hbm %s3862_s17, 512 }
  0x42   :  { %p2785_p2 = scmp.ne.s32.totalorder %s3862_s17, %s2784_s6  ;;  %p2788_p3 = scmp.lt.u32.totalorder %s2784_s6, %s3862_s17 }
  0x44   :  { %p2790_p4 = pnand %p2788_p3, %p2785_p2 }
  0x46   :  { %2793 = shalt.err (!%p2790_p4)
}
  0x47   :  { %s2794_s7 = scalar_lea.vmem %s129_s9, 512  ;;  %p2799_p6 = scmp.lt.s32.totalorder %s129_s9, %s129_s9 }
  0x48   :  { %p2795_p5 = scmp.ne.s32.totalorder %s129_s9, %s2794_s7  ;;  %p2800_p7 = scmp.lt.s32.totalorder %s2794_s7, %s2794_s7 }
  0x4a   :  { %p2801_p8 = por %p2800_p7, %p2799_p6 }
  0x4c   :  { %p2802_p9 = pnand %p2801_p8, %p2795_p5 }
  0x4e   :  { %2805 = shalt.err (!%p2802_p9)
}
  0x4f   :  { %134 = dma.hbm_to_vmem [thread:$0]  %s3862_s17, 512, %s129_s9, [#allocation13], %s2999_s10, %s2999_s10, %s3000_s12  }
  0x50   :  { %s3001_s30 = smov [#allocation15]   ;;  %s3002_s4 = smov [#allocation3]  }
  0x51   :  { %s156_s1 = sshll.u32 %s3001_s30, 4  ;;  %s59_s5 = sshll.u32 %s3002_s4, 4  ;;  %s157_s1 = int_to_ptr.vmem [resolvable:$true] %s156_s1  ;;  %s60_s5 = int_to_ptr.vmem [resolvable:$true] %s59_s5 }
  0x52   :  { %s2806_s11 = scalar_lea.hbm %s3866_s21, 512 }
  0x53   :  { %p2807_p10 = scmp.ne.s32.totalorder %s3866_s21, %s2806_s11  ;;  %p2810_p11 = scmp.lt.u32.totalorder %s2806_s11, %s3866_s21 }
  0x55   :  { %p2812_p12 = pnand %p2810_p11, %p2807_p10 }
  0x57   :  { %2815 = shalt.err (!%p2812_p12)
}
  0x58   :  { %s2816_s17 = scalar_lea.vmem %s157_s1, 512  ;;  %p2821_p0 = scmp.lt.s32.totalorder %s157_s1, %s157_s1 }
  0x59   :  { %p2817_p13 = scmp.ne.s32.totalorder %s157_s1, %s2816_s17  ;;  %p2822_p1 = scmp.lt.s32.totalorder %s2816_s17, %s2816_s17 }
  0x5b   :  { %p2823_p2 = por %p2822_p1, %p2821_p0 }
  0x5d   :  { %p2824_p3 = pnand %p2823_p2, %p2817_p13 }
  0x5f   :  { %2827 = shalt.err (!%p2824_p3)
}
  0x60   :  { %162 = dma.hbm_to_vmem [thread:$0]  %s3866_s21, 512, %s157_s1, [#allocation16], %s2999_s10, %s2999_s10, %s3000_s12  }
  0x61   :  { %s3898_s4 = sld [smem:[#allocation33_spill]] }
  0x67   :  { %s2828_s3 = scalar_lea.hbm %s3898_s4, 128 }
  0x68   :  { %p2829_p4 = scmp.ne.s32.totalorder %s3898_s4, %s2828_s3  ;;  %p2832_p5 = scmp.lt.u32.totalorder %s2828_s3, %s3898_s4 }
  0x6a   :  { %p2834_p6 = pnand %p2832_p5, %p2829_p4 }
  0x6c   :  { %2837 = shalt.err (!%p2834_p6)
}
  0x6d   :  { %s2838_s2 = scalar_lea.vmem %s60_s5, 128  ;;  %p2843_p8 = scmp.lt.s32.totalorder %s60_s5, %s60_s5 }
  0x6e   :  { %p2839_p7 = scmp.ne.s32.totalorder %s60_s5, %s2838_s2  ;;  %p2844_p9 = scmp.lt.s32.totalorder %s2838_s2, %s2838_s2 }
  0x70   :  { %p2845_p10 = por %p2844_p9, %p2843_p8 }
  0x72   :  { %p2846_p11 = pnand %p2845_p10, %p2839_p7 }
  0x74   :  { %2849 = shalt.err (!%p2846_p11)
}
  0x75   :  { %62 = dma.hbm_to_vmem [thread:$0]  %s3898_s4, 128, %s60_s5, [#allocation4]  }
  0x76   :  { %s3003_s7 = smov [#allocation8]   ;;  %s3004_s9 = smov [#allocation11]  }
  0x77   :  { %s78_s17 = sshll.u32 %s3003_s7, 4  ;;  %s114_s8 = sshll.u32 %s3004_s9, 4  ;;  %s79_s17 = int_to_ptr.vmem [resolvable:$true] %s78_s17  ;;  %s115_s8 = int_to_ptr.vmem [resolvable:$true] %s114_s8 }
  0x78   :  { %s3899_s3 = sld [smem:[#allocation35_spill]] }
  0x7e   :  { %s2850_s6 = scalar_lea.hbm %s3899_s3, 512 }
  0x7f   :  { %p2851_p12 = scmp.ne.s32.totalorder %s3899_s3, %s2850_s6  ;;  %p2854_p13 = scmp.lt.u32.totalorder %s2850_s6, %s3899_s3 }
  0x81   :  { %p2856_p0 = pnand %p2854_p13, %p2851_p12 }
  0x83   :  { %2859 = shalt.err (!%p2856_p0)
}
  0x84   :  { %s2860_s5 = scalar_lea.vmem %s79_s17, 512  ;;  %p2865_p2 = scmp.lt.s32.totalorder %s79_s17, %s79_s17 }
  0x85   :  { %p2861_p1 = scmp.ne.s32.totalorder %s79_s17, %s2860_s5  ;;  %p2866_p3 = scmp.lt.s32.totalorder %s2860_s5, %s2860_s5 }
  0x87   :  { %p2867_p4 = por %p2866_p3, %p2865_p2 }
  0x89   :  { %p2868_p5 = pnand %p2867_p4, %p2861_p1 }
  0x8b   :  { %2871 = shalt.err (!%p2868_p5)
}
  0x8c   :  { %84 = dma.hbm_to_vmem [thread:$0]  %s3899_s3, 512, %s79_s17, [#allocation7], %s2999_s10, %s2999_s10, %s3000_s12  }
  0x8d   :  { %s2872_s9 = scalar_lea.hbm %s3860_s15, 1536 }
  0x8e   :  { %p2873_p6 = scmp.ne.s32.totalorder %s3860_s15, %s2872_s9  ;;  %p2876_p7 = scmp.lt.u32.totalorder %s2872_s9, %s3860_s15 }
  0x90   :  { %p2878_p8 = pnand %p2876_p7, %p2873_p6 }
  0x92   :  { %2881 = shalt.err (!%p2878_p8)
}
  0x93   :  { %s2882_s29 = scalar_lea.vmem %s115_s8, 1536  ;;  %p2887_p10 = scmp.lt.s32.totalorder %s115_s8, %s115_s8 }
  0x94   :  { %p2883_p9 = scmp.ne.s32.totalorder %s115_s8, %s2882_s29  ;;  %p2888_p11 = scmp.lt.s32.totalorder %s2882_s29, %s2882_s29 }
  0x96   :  { %p2889_p12 = por %p2888_p11, %p2887_p10 }
  0x98   :  { %p2890_p13 = pnand %p2889_p12, %p2883_p9 }
  0x9a   :  { %2893 = shalt.err (!%p2890_p13)
}
  0x9b   :  { %120 = dma.hbm_to_vmem [thread:$0]  %s3860_s15, 1536, %s115_s8, [#allocation10], %s2999_s10, %s2999_s10, %s3000_s12  }
  0x9c   :  { %s3005_s25 = smov [#allocation14]   ;;  %s3006_s5 = smov [#allocation17]  }
  0x9d   :  { %s144_s2 = sshll.u32 %s3005_s25, 4  ;;  %s171_s4 = sshll.u32 %s3006_s5, 4  ;;  %s145_s2 = int_to_ptr.vmem [resolvable:$true] %s144_s2  ;;  %s172_s4 = int_to_ptr.vmem [resolvable:$true] %s171_s4 }
  0x9e   :  { %s2894_s7 = scalar_lea.hbm %s3865_s20, 512 }
  0x9f   :  { %p2895_p0 = scmp.ne.s32.totalorder %s3865_s20, %s2894_s7  ;;  %p2898_p1 = scmp.lt.u32.totalorder %s2894_s7, %s3865_s20 }
  0xa1   :  { %p2900_p2 = pnand %p2898_p1, %p2895_p0 }
  0xa3   :  { %2903 = shalt.err (!%p2900_p2)
}
  0xa4   :  { %s2904_s15 = scalar_lea.vmem %s145_s2, 512  ;;  %p2909_p4 = scmp.lt.s32.totalorder %s145_s2, %s145_s2 }
  0xa5   :  { %p2905_p3 = scmp.ne.s32.totalorder %s145_s2, %s2904_s15  ;;  %p2910_p5 = scmp.lt.s32.totalorder %s2904_s15, %s2904_s15 }
  0xa7   :  { %p2911_p6 = por %p2910_p5, %p2909_p4 }
  0xa9   :  { %p2912_p7 = pnand %p2911_p6, %p2905_p3 }
  0xab   :  { %2915 = shalt.err (!%p2912_p7)
}
  0xac   :  { %150 = dma.hbm_to_vmem [thread:$0]  %s3865_s20, 512, %s145_s2, [#allocation13], %s2999_s10, %s2999_s10, %s3000_s12  }
  0xad   :  { %s2916_s3 = scalar_lea.hbm %s3868_s23, 16 }
  0xae   :  { %p2917_p8 = scmp.ne.s32.totalorder %s3868_s23, %s2916_s3  ;;  %p2920_p9 = scmp.lt.u32.totalorder %s2916_s3, %s3868_s23 }
  0xb0   :  { %p2922_p10 = pnand %p2920_p9, %p2917_p8 }
  0xb2   :  { %2925 = shalt.err (!%p2922_p10)
}
  0xb3   :  { %s2926_s7 = scalar_lea.vmem %s172_s4, 16  ;;  %s2930_s9 = scalar_lea.vmem %s172_s4, 32 }
  0xb4   :  { %p2927_p11 = scmp.ne.s32.totalorder %s172_s4, %s2926_s7  ;;  %p2931_p12 = scmp.lt.s32.totalorder %s172_s4, %s172_s4 }
  0xb5   :  { %p2932_p13 = scmp.lt.s32.totalorder %s2930_s9, %s2926_s7 }
  0xb7   :  { %p2933_p0 = por %p2932_p13, %p2931_p12 }
  0xb9   :  { %p2934_p1 = pnand %p2933_p0, %p2927_p11 }
  0xbb   :  { %2937 = shalt.err (!%p2934_p1)
}
  0xbc   :  { %174 = dma.hbm_to_vmem [thread:$0]  %s3868_s23, 16, %s172_s4, [#allocation16]  }
  0xbd   :  { %s3007_s12 = smov [#allocation18]   ;;  %s2938_s6 = scalar_lea.hbm %s3869_s24, 16 }
  0xbe   :  { %s181_s2 = sshll.u32 %s3007_s12, 4  ;;  %p2939_p2 = scmp.ne.s32.totalorder %s3869_s24, %s2938_s6  ;;  %s182_s2 = int_to_ptr.vmem [resolvable:$true] %s181_s2 }
  0xbf   :  { %p2942_p3 = scmp.lt.u32.totalorder %s2938_s6, %s3869_s24 }
  0xc1   :  { %p2944_p4 = pnand %p2942_p3, %p2939_p2 }
  0xc3   :  { %2947 = shalt.err (!%p2944_p4)
}
  0xc4   :  { %s2948_s17 = scalar_lea.vmem %s182_s2, 16  ;;  %s2952_s23 = scalar_lea.vmem %s182_s2, 32 }
  0xc5   :  { %p2949_p5 = scmp.ne.s32.totalorder %s182_s2, %s2948_s17  ;;  %p2953_p6 = scmp.lt.s32.totalorder %s182_s2, %s182_s2 }
  0xc6   :  { %p2954_p7 = scmp.lt.s32.totalorder %s2952_s23, %s2948_s17 }
  0xc8   :  { %p2955_p8 = por %p2954_p7, %p2953_p6 }
  0xca   :  { %p2956_p9 = pnand %p2955_p8, %p2949_p5 }
  0xcc   :  { %2959 = shalt.err (!%p2956_p9)
}
  0xcd   :  { %184 = dma.hbm_to_vmem [thread:$0]  %s3869_s24, 16, %s182_s2, [#allocation19]  }
  0xce   :  { %2982 = dma.done.wait [#allocation4], 128  }
  0xcf   :  { %2983 = vsyncadd [#allocation4], 4294967168 }
  0xd0   :  { %2984 = dma.done.wait [#allocation7], 640  }
  0xd1   :  { %2985 = vsyncadd [#allocation7], 4294966656 }
  0xd2   :  { %2986 = dma.done.wait [#allocation10], 2048  }
  0xd3   :  { %2987 = vsyncadd [#allocation10], 4294965248 }
  0xd4   :  { %2988 = dma.done.wait [#allocation13], 1024  }
  0xd5   :  { %2989 = vsyncadd [#allocation13], 4294966272 }
  0xd6   :  { %2990 = dma.done.wait [#allocation16], 528  }
  0xd7   :  { %2991 = vsyncadd [#allocation16], 4294966768 }
  0xd8   :  { %2992 = dma.done.wait [#allocation19], 16  }
  0xd9   :  { %2993 = vsyncadd [#allocation19], 4294967280  ;;  %v3008_v1 = vmov 0.0|0.0   ;;  %vm3009_vm0 = vmmov 0   ;;  %v3010_v2 = vmov 0.0   ;;  %v314_v3 = vld [vmem:[#allocation9] sm:$0xff] }
  0xda   :  { %2538 = vmatprep.subr.bf16.mxu0 %v3008_v1  ;;  %2336 = vmatprep.mubr.msk.f32.mxu0 %vm3009_vm0, %v3010_v2  ;;  %v315_v4 = vld [vmem:[#allocation9 + $0x8] sm:$0xff]  ;;  %v236_v5 = vld [vmem:[#allocation8] sm:$0xff]  ;;  %vm240_vm1 = vcmask 261120   ;;  %v316_v8 = vld [vmem:[#allocation9 + $0x10] sm:$0xff]  ;;  %s3900_s5 = sld [smem:[#allocation29_spill]]  ;;  %s3901_s7 = sld [smem:[#allocation28_spill]] }
  0xdb   :  { %v2544_v6 = vpack.c.bf16 %v315_v4, %v314_v3  ;;  %v237_v7 = vld [vmem:[#allocation8 + $0x8] sm:$0xff]  ;;  %v317_v9 = vld [vmem:[#allocation9 + $0x18] sm:$0xff]  ;;  %v238_v12 = vld [vmem:[#allocation8 + $0x10] sm:$0xff]  ;;  %s3902_s17 = sld [smem:[#allocation37_spill]]  ;;  %s3903_s4 = sld [smem:[#allocation38_spill]]  ;;  %vm721_vm2 = vcmask 1041409  }
  0xdc   :  { %v2539_v10 = vpack.c.bf16 %v237_v7, %v236_v5  ;;  %v2548_v11 = vpack.c.bf16 %v317_v9, %v316_v8  ;;  %v239_v13 = vld [vmem:[#allocation8 + $0x18] sm:$0xff]  ;;  %vm723_vm3 = vcmask 1042434   ;;  %vm725_vm4 = vcmask 1043459   ;;  %s3904_s25 = sld [smem:[#allocation30_spill]]  ;;  %s3905_s10 = sld [smem:[#allocation40_spill]] }
  0xdd   :  { %2545 = vmatprep.subr.bf16.mxu1 %v2544_v6  ;;  %v2542_v15 = vpack.c.bf16 %v239_v13, %v238_v12  ;;  %vm727_vm5 = vcmask 1044484   ;;  %vm729_vm6 = vcmask 1045509   ;;  %vm731_vm7 = vcmask 1046534   ;;  %s3906_s21 = sld [smem:[#allocation39_spill]]  ;;  %s3908_s1 = sld [smem:[#allocation32_spill]] }
  0xde   :  { %2540 = vmatpush3.bf16.msra.mxu0 %v2539_v10  ;;  %2547 = vmatpush3.bf16.msra.mxu1 %v2544_v6  ;;  %vm733_vm8 = vcmask 1047559   ;;  %vm746_vm11 = vcmask 64512   ;;  %s3907_s2 = sld [smem:[#allocation31_spill]] }
  0xdf   :  { %2541 = vmatprep.subr.bf16.mxu0 %v3008_v1  ;;  %2549 = vmatprep.subr.bf16.mxu1 %v2548_v11 }
  0xe0   :  { %v3306_v14 = vld [vmem:[%s3900_s5] sm:$0xff]  ;;  %v3319_v17 = vld [vmem:[%s3900_s5 + $0x8] sm:$0xff]  ;;  %v3324_v18 = vld [vmem:[%s3900_s5 + $0x10] sm:$0xff] }
  0xe1   :  { %2347 = vmatprep.mubr.msk.f32.mxu1 %vm240_vm1, %v3306_v14  ;;  %v3314_v16 = vld [vmem:[%s3901_s7] sm:$0xff]  ;;  %v3337_v19 = vld [vmem:[%s3900_s5 + $0x18] sm:$0xff]  ;;  %v3353_v21 = vld [vmem:[%s3900_s5 + $0x28] sm:$0xff] }
  0xe2   :  { %2543 = vmatpush3.bf16.msra.mxu0 %v2542_v15  ;;  %2551 = vmatpush3.bf16.msra.mxu1 %v2548_v11  ;;  %v3344_v20 = vld [vmem:[%s3900_s5 + $0x20] sm:$0xff]  ;;  %v3358_v22 = vld [vmem:[%s3900_s5 + $0x30] sm:$0xff]  ;;  %v3367_v23 = vld [vmem:[%s3900_s5 + $0x38] sm:$0xff] }
  0xe3   :  { %2552 = vmatprep.subr.bf16.mxu0 %v3008_v1  ;;  %2588 = vmatprep.subr.bf16.mxu1 %v3008_v1  ;;  %v3372_v24 = vld [vmem:[%s3900_s5 + $0x40] sm:$0xff]  ;;  %v3381_v25 = vld [vmem:[%s3900_s5 + $0x48] sm:$0xff]  ;;  %v3386_v26 = vld [vmem:[%s3900_s5 + $0x50] sm:$0xff] }
  0xe4   :  { %v3395_v27 = vld [vmem:[%s3900_s5 + $0x58] sm:$0xff]  ;;  %v3400_v28 = vld [vmem:[%s3900_s5 + $0x60] sm:$0xff]  ;;  %v3409_v29 = vld [vmem:[%s3900_s5 + $0x68] sm:$0xff] }
  0xe5   :  { %2337 = vmatmul.mubr.msk.f32.vlgmr.msra.gmra.mrb[0].mxu0 %vm240_vm1, %v3314_v16  ;;  %2348 = vmatmul.mubr.msk.f32.vlgmr.msra.gmra.mrb[0].mxu1 %vm240_vm1, %v3319_v17  ;;  %v3414_v30 = vld [vmem:[%s3900_s5 + $0x70] sm:$0xff]  ;;  %v3423_v31 = vld [vmem:[%s3900_s5 + $0x78] sm:$0xff]  ;;  %v3434_v34 = vld [vmem:[%s3902_s17] ss:$0 sm:$0xff] }
  0xe6   :  { %2350 = vmatprep.mubr.msk.f32.mxu1 %vm240_vm1, %v3324_v18  ;;  %2379 = vmatprep.mubr.msk.f32.mxu0 %vm3009_vm0, %v3010_v2  ;;  %v3451_v55 = vld [vmem:[%s3903_s4] ss:$0 sm:$0xff] }
  0xe9   :  { %2351 = vmatmul.mubr.msk.f32.gmra.mrb[2].mxu1 %vm240_vm1, %v3337_v19 }
  0xea   :  { %2353 = vmatprep.mubr.msk.f32.mxu1 %vm240_vm1, %v3344_v20 }
  0xed   :  { %2354 = vmatmul.mubr.msk.f32.gmra.mrb[4].mxu1 %vm240_vm1, %v3353_v21 }
  0xee   :  { %2356 = vmatprep.mubr.msk.f32.mxu1 %vm240_vm1, %v3358_v22 }
  0xf1   :  { %2357 = vmatmul.mubr.msk.f32.gmra.mrb[6].mxu1 %vm240_vm1, %v3367_v23 }
  0xf2   :  { %2359 = vmatprep.mubr.msk.f32.mxu1 %vm240_vm1, %v3372_v24 }
  0xf5   :  { %2360 = vmatmul.mubr.msk.f32.gmra.mrb[8].mxu1 %vm240_vm1, %v3381_v25 }
  0xf6   :  { %2362 = vmatprep.mubr.msk.f32.mxu1 %vm240_vm1, %v3386_v26 }
  0xf9   :  { %2363 = vmatmul.mubr.msk.f32.gmra.mrb[10].mxu1 %vm240_vm1, %v3395_v27 }
  0xfa   :  { %2365 = vmatprep.mubr.msk.f32.mxu1 %vm240_vm1, %v3400_v28 }
  0xfd   :  { %2366 = vmatmul.mubr.msk.f32.gmra.mrb[12].mxu1 %vm240_vm1, %v3409_v29 }
  0xfe   :  { %2368 = vmatprep.mubr.msk.f32.mxu1 %vm240_vm1, %v3414_v30 }
 0x101   :  { %2369 = vmatmul.mubr.msk.f32.gmra.mrb[14].mxu1 %vm240_vm1, %v3423_v31 }
 0x102   :  { %2445 = vmatprep.mubr.msk.f32.mxu1 %vm3009_vm0, %v3010_v2 }
 0x1b8   :  { %v3429_v32 = vpop.f32.mrb[0].mxu0  ;;  %v2349_v33 = vpop.f32.mrb[0].mxu1 }
 0x1b9   :  { %v512_v35 = vadd.f32 %v2349_v33, %v3429_v32  ;;  %v432_v36 = vpop.f32.mrb[1].mxu1  ;;  %v2338_v37 = vpop.f32.mrb[1].mxu0 }
 0x1ba   :  { %v511_v38 = vadd.f32 %v432_v36, %v3429_v32 }
 0x1bb   :  { %v535_v39 = vadd.f32 %v3434_v34, %v512_v35 }
 0x1bc   :  { %v534_v40 = vadd.f32 %v3434_v34, %v511_v38  ;;  %v2352_v41 = vpop.f32.mrb[2].mxu1 }
 0x1bd   :  { %2681 = vtanh.f32 %v535_v39  ;;  %v514_v42 = vadd.f32 %v2352_v41, %v3429_v32  ;;  %v442_v43 = vpop.f32.mrb[3].mxu1 }
 0x1be   :  { %2683 = vtanh.f32 %v534_v40  ;;  %v513_v44 = vadd.f32 %v442_v43, %v3429_v32 }
 0x1bf   :  { %v537_v45 = vadd.f32 %v3434_v34, %v514_v42 }
 0x1c0   :  { %v2355_v46 = vpop.f32.mrb[4].mxu1  ;;  %v536_v47 = vadd.f32 %v3434_v34, %v513_v44 }
 0x1c1   :  { %2685 = vtanh.f32 %v537_v45  ;;  %v516_v48 = vadd.f32 %v2355_v46, %v3429_v32  ;;  %v452_v49 = vpop.f32.mrb[5].mxu1 }
 0x1c2   :  { %v515_v50 = vadd.f32 %v452_v49, %v3429_v32  ;;  %2687 = vtanh.f32 %v536_v47 }
 0x1c3   :  { %v539_v52 = vadd.f32 %v3434_v34, %v516_v48 }
 0x1c4   :  { %v2358_v51 = vpop.f32.mrb[6].mxu1  ;;  %v538_v59 = vadd.f32 %v3434_v34, %v515_v50 }
 0x1c5   :  { %v518_v53 = vadd.f32 %v2358_v51, %v3429_v32  ;;  %v462_v54 = vpop.f32.mrb[7].mxu1  ;;  %2689 = vtanh.f32 %v539_v52 }
 0x1c6   :  { %v517_v56 = vadd.f32 %v462_v54, %v3429_v32  ;;  %2691 = vtanh.f32 %v538_v59 }
 0x1c7   :  { %v2682_v57 = vpop.eup %2681  ;;  %v541_v36 = vadd.f32 %v3434_v34, %v518_v53 }
 0x1c8   :  { %v2684_v58 = vpop.eup %2683  ;;  %v2361_v60 = vpop.f32.mrb[8].mxu1  ;;  %v574_v61 = vmul.f32 %v2682_v57, %v3451_v55  ;;  %v540_v7 = vadd.f32 %v3434_v34, %v517_v56 }
 0x1c9   :  { %v520_v62 = vadd.f32 %v2361_v60, %v3429_v32  ;;  %v472_v63 = vpop.f32.mrb[9].mxu1  ;;  %v573_v4 = vmul.f32 %v2684_v58, %v3451_v55 }
 0x1ca   :  { %v519_v0 = vadd.f32 %v472_v63, %v3429_v32  ;;  %v592_v3 = vsel %vm240_vm1, %v574_v61, 0.0 }
 0x1cb   :  { %v2686_v5 = vpop.eup %2685  ;;  %v543_v6 = vadd.f32 %v3434_v34, %v520_v62  ;;  %593 = vadd.xlane.f32.xlu0 %v592_v3  ;;  %v589_v13 = vsel %vm240_vm1, %v573_v4, 0.0 }
 0x1cc   :  { %v542_v8 = vadd.f32 %v3434_v34, %v519_v0  ;;  %v2364_v9 = vpop.f32.mrb[10].mxu1  ;;  %v576_v15 = vmul.f32 %v2686_v5, %v3451_v55  ;;  %v2688_v33 = vpop.eup %2687 }
 0x1cd   :  { %2693 = vtanh.f32 %v543_v6  ;;  %v522_v10 = vadd.f32 %v2364_v9, %v3429_v32  ;;  %v482_v11 = vpop.f32.mrb[11].mxu1  ;;  %v575_v43 = vmul.f32 %v2688_v33, %v3451_v55 }
 0x1ce   :  { %2695 = vtanh.f32 %v542_v8  ;;  %v521_v12 = vadd.f32 %v482_v11, %v3429_v32  ;;  %v598_v42 = vsel %vm240_vm1, %v576_v15, 0.0 }
 0x1cf   :  { %v545_v35 = vadd.f32 %v3434_v34, %v522_v10  ;;  %590 = vadd.xlane.f32.xlu0 %v589_v13  ;;  %2697 = vtanh.f32 %v540_v7  ;;  %v2690_v44 = vpop.eup %2689  ;;  %v595_v51 = vsel %vm240_vm1, %v575_v43, 0.0 }
 0x1d0   :  { %v2367_v37 = vpop.f32.mrb[12].mxu1  ;;  %v544_v38 = vadd.f32 %v3434_v34, %v521_v12  ;;  %v2692_v49 = vpop.eup %2691  ;;  %v578_v52 = vmul.f32 %v2690_v44, %v3451_v55 }
 0x1d1   :  { %2699 = vtanh.f32 %v545_v35  ;;  %v524_v39 = vadd.f32 %v2367_v37, %v3429_v32  ;;  %v492_v40 = vpop.f32.mrb[13].mxu1 }
 0x1d2   :  { %v523_v41 = vadd.f32 %v492_v40, %v3429_v32  ;;  %2701 = vtanh.f32 %v541_v36  ;;  %v604_v60 = vsel %vm240_vm1, %v578_v52, 0.0 }
 0x1d3   :  { %599 = vadd.xlane.f32.xlu0 %v598_v42  ;;  %2703 = vtanh.f32 %v544_v38  ;;  %v547_v46 = vadd.f32 %v3434_v34, %v524_v39 }
 0x1d4   :  { %v2370_v45 = vpop.f32.mrb[14].mxu1  ;;  %v546_v57 = vadd.f32 %v3434_v34, %v523_v41 }
 0x1d5   :  { %v526_v47 = vadd.f32 %v2370_v45, %v3429_v32  ;;  %v502_v48 = vpop.f32.mrb[15].mxu1  ;;  %2705 = vtanh.f32 %v547_v46 }
 0x1d6   :  { %v525_v50 = vadd.f32 %v502_v48, %v3429_v32  ;;  %v577_v32 = vmul.f32 %v2692_v49, %v3451_v55  ;;  %2707 = vtanh.f32 %v546_v57 }
 0x1d7   :  { %v2694_v53 = vpop.eup %2693  ;;  %596 = vadd.xlane.f32.xlu0 %v595_v51  ;;  %v549_v8 = vadd.f32 %v3434_v34, %v526_v47  ;;  %v655_v51 = vlaneseq }
 0x1d8   :  { %v2696_v54 = vpop.eup %2695  ;;  %v582_v56 = vmul.f32 %v2694_v53, %v3451_v55  ;;  %v548_v63 = vadd.f32 %v3434_v34, %v525_v50  ;;  %v601_v4 = vsel %vm240_vm1, %v577_v32, 0.0 }
 0x1d9   :  { %v2698_v58 = vpop.eup %2697  ;;  %v581_v61 = vmul.f32 %v2696_v54, %v3451_v55  ;;  %v3505_v53 = vand.u32 127, %v655_v51  ;;  %v3507_v54 = vshrl.u32 %v655_v51, 7 }
 0x1da   :  { %v616_v59 = vsel %vm240_vm1, %v582_v56, 0.0  ;;  %v579_v6 = vmul.f32 %v2698_v58, %v3451_v55  ;;  %2709 = vtanh.f32 %v548_v63 }
 0x1db   :  { %v2700_v62 = vpop.eup %2699  ;;  %617 = vadd.xlane.f32.xlu1 %v616_v59  ;;  %605 = vadd.xlane.f32.xlu0 %v604_v60  ;;  %v613_v3 = vsel %vm240_vm1, %v581_v61, 0.0  ;;  %2711 = vtanh.f32 %v549_v8 }
 0x1dc   :  { %v2702_v0 = vpop.eup %2701  ;;  %v584_v5 = vmul.f32 %v2700_v62, %v3451_v55  ;;  %v607_v10 = vsel %vm240_vm1, %v579_v6, 0.0 }
 0x1dd   :  { %v2704_v7 = vpop.eup %2703  ;;  %v580_v12 = vmul.f32 %v2702_v0, %v3451_v55 }
 0x1de   :  { %v622_v9 = vsel %vm240_vm1, %v584_v5, 0.0  ;;  %v583_v11 = vmul.f32 %v2704_v7, %v3451_v55 }
 0x1df   :  { %614 = vadd.xlane.f32.xlu1 %v613_v3  ;;  %602 = vadd.xlane.f32.xlu0 %v601_v4  ;;  %v2706_v13 = vpop.eup %2705  ;;  %v610_v33 = vsel %vm240_vm1, %v580_v12, 0.0 }
 0x1e0   :  { %v619_v15 = vsel %vm240_vm1, %v583_v11, 0.0  ;;  %v586_v35 = vmul.f32 %v2706_v13, %v3451_v55  ;;  %v2708_v34 = vpop.eup %2707 }
 0x1e1   :  { %v585_v37 = vmul.f32 %v2708_v34, %v3451_v55 }
 0x1e2   :  { %v628_v36 = vsel %vm240_vm1, %v586_v35, 0.0 }
 0x1e3   :  { %623 = vadd.xlane.f32.xlu1 %v622_v9  ;;  %608 = vadd.xlane.f32.xlu0 %v607_v10  ;;  %v625_v39 = vsel %vm240_vm1, %v585_v37, 0.0  ;;  %v234_v37 = vld [vmem:[%s3904_s25] sm:$0xff] }
 0x1e4   :  { %v2710_v38 = vpop.eup %2709  ;;  %vm637_vm9 = vcmp.eq.f32.partialorder %v234_v37, 0.0 }
 0x1e5   :  { %v587_v40 = vmul.f32 %v2710_v38, %v3451_v55  ;;  %v2712_v41 = vpop.eup %2711 }
 0x1e6   :  { %v588_v43 = vmul.f32 %v2712_v41, %v3451_v55  ;;  %v659_v55 = vsub.s32 %v3505_v53, %v3507_v54 }
 0x1e7   :  { %620 = vadd.xlane.f32.xlu1 %v619_v15  ;;  %611 = vadd.xlane.f32.xlu0 %v610_v33  ;;  %v631_v42 = vsel %vm240_vm1, %v587_v40, 0.0 }
 0x1e8   :  { %v634_v44 = vsel %vm240_vm1, %v588_v43, 0.0 }
 0x1eb   :  { %629 = vadd.xlane.f32.xlu1 %v628_v36 }
 0x1ef   :  { %626 = vadd.xlane.f32.xlu1 %v625_v39 }
 0x1f3   :  { %632 = vadd.xlane.f32.xlu1 %v631_v42 }
 0x1f7   :  { %635 = vadd.xlane.f32.xlu1 %v634_v44  ;;  %v235_v44 = vld [vmem:[%s3904_s25 + $0x8] sm:$0xff]  ;;  %s3013_s25 = smov [#allocation20]  }
 0x1f8   :  { %vm638_vm10 = vcmp.eq.f32.partialorder %v235_v44, 0.0 }
 0x258   :  { %v594_v45 = vpop.xlane.xlu0 %593 }
 0x259   :  { %v664_v32 = vrot.slane %v594_v45, %v659_v55 }
 0x25c   :  { %v591_v46 = vpop.xlane.xlu0 %590 }
 0x25d   :  { %v660_v59 = vrot.slane %v591_v46, %v659_v55 }
 0x25f   :  { %v722_v63 = vsel %vm721_vm2, %v664_v32, %v660_v59 }
 0x260   :  { %v600_v47 = vpop.xlane.xlu0 %599 }
 0x261   :  { %v672_v6 = vrot.slane %v600_v47, %v659_v55 }
 0x264   :  { %v597_v48 = vpop.xlane.xlu0 %596 }
 0x265   :  { %v668_v60 = vrot.slane %v597_v48, %v659_v55 }
 0x267   :  { %v724_v3 = vsel %vm723_vm3, %v668_v60, %v722_v63 }
 0x268   :  { %v618_v49 = vpop.xlane.xlu1 %617  ;;  %v606_v50 = vpop.xlane.xlu0 %605  ;;  %v726_v11 = vsel %vm725_vm4, %v672_v6, %v724_v3 }
 0x269   :  { %v696_v7 = vrot.slane %v618_v49, %v659_v55  ;;  %v680_v35 = vrot.slane %v606_v50, %v659_v55 }
 0x26c   :  { %v615_v52 = vpop.xlane.xlu1 %614  ;;  %v603_v56 = vpop.xlane.xlu0 %602 }
 0x26d   :  { %v692_v0 = vrot.slane %v615_v52, %v659_v55  ;;  %v676_v4 = vrot.slane %v603_v56, %v659_v55 }
 0x26f   :  { %v735_v10 = vsel %vm721_vm2, %v696_v7, %v692_v0  ;;  %v728_v12 = vsel %vm727_vm5, %v676_v4, %v726_v11 }
 0x270   :  { %v624_v57 = vpop.xlane.xlu1 %623  ;;  %v609_v61 = vpop.xlane.xlu0 %608  ;;  %v730_v39 = vsel %vm729_vm6, %v680_v35, %v728_v12 }
 0x271   :  { %v684_v13 = vrot.slane %v609_v61, %v659_v55  ;;  %v704_v34 = vrot.slane %v624_v57, %v659_v55 }
 0x273   :  { %v732_v41 = vsel %vm731_vm7, %v684_v13, %v730_v39 }
 0x274   :  { %v621_v58 = vpop.xlane.xlu1 %620  ;;  %v612_v8 = vpop.xlane.xlu0 %611 }
 0x275   :  { %v700_v5 = vrot.slane %v621_v58, %v659_v55  ;;  %v688_v36 = vrot.slane %v612_v8, %v659_v55 }
 0x277   :  { %v736_v15 = vsel %vm723_vm3, %v700_v5, %v735_v10  ;;  %v734_v45 = vsel %vm733_vm8, %v688_v36, %v732_v41  ;;  %v776_v36 = vsub.s32 0, %v3507_v54  ;;  %v790_v41 = vsub.s32 2, %v3507_v54 }
 0x278   :  { %v630_v62 = vpop.xlane.xlu1 %629  ;;  %v737_v40 = vsel %vm725_vm4, %v704_v34, %v736_v15  ;;  %v744_v50 = vsel %vm637_vm9, -1000000.0, %v734_v45  ;;  %v783_v34 = vsub.s32 1, %v3507_v54  ;;  %v797_v45 = vsub.s32 3, %v3507_v54 }
 0x279   :  { %v712_v46 = vrot.slane %v630_v62, %v659_v55  ;;  %v747_v57 = vsel %vm746_vm11, %v744_v50, -inf }
 0x27c   :  { %v627_v9 = vpop.xlane.xlu1 %626 }
 0x27d   :  { %v708_v33 = vrot.slane %v627_v9, %v659_v55 }
 0x27f   :  { %v738_v42 = vsel %vm727_vm5, %v708_v33, %v737_v40 }
 0x280   :  { %v633_v38 = vpop.xlane.xlu1 %632  ;;  %v739_v48 = vsel %vm729_vm6, %v712_v46, %v738_v42  ;;  %v804_v42 = vsub.s32 4, %v3507_v54  ;;  %v818_v46 = vsub.s32 6, %v3507_v54 }
 0x281   :  { %v716_v43 = vrot.slane %v633_v38, %v659_v55 }
 0x283   :  { %v740_v51 = vsel %vm731_vm7, %v716_v43, %v739_v48 }
 0x284   :  { %v636_v47 = vpop.xlane.xlu1 %635 }
 0x285   :  { %v720_v49 = vrot.slane %v636_v47, %v659_v55 }
 0x287   :  { %v741_v52 = vsel %vm733_vm8, %v720_v49, %v740_v51  ;;  %v939_v51 = vld [vmem:[%s3905_s10] sm:$0xff] }
 0x288   :  { %v745_v56 = vsel %vm638_vm10, -1000000.0, %v741_v52  ;;  %v940_v52 = vld [vmem:[%s3905_s10 + $0x8] sm:$0xff] }
 0x289   :  { %v748_v58 = vsel %vm746_vm11, %v745_v56, -inf }
 0x28a   :  { %v749_v59 = vmax.f32 %v747_v57, %v748_v58  ;;  %v825_v58 = vsub.s32 7, %v3507_v54 }
 0x28c   :  { %v750_v60 = vrot.slane %v749_v59, 4 }
 0x28e   :  { %v751_v61 = vmax.f32 %v749_v59, %v750_v60  ;;  %v2553_v59 = vpack.c.bf16 %v940_v52, %v939_v51  ;;  %v2202_v60 = vld [vmem:[%s3905_s10 + $0x40] sm:$0xff] }
 0x290   :  { %v752_v32 = vrot.slane %v751_v61, 2  ;;  %2554 = vmatpush3.bf16.msra.mxu0 %v2553_v59 }
 0x291   :  { %2555 = vmatprep.subr.bf16.mxu0 %v3008_v1 }
 0x292   :  { %v753_v62 = vmax.f32 %v751_v61, %v752_v32  ;;  %v2203_v61 = vld [vmem:[%s3905_s10 + $0x48] sm:$0xff] }
 0x293   :  { %v2589_v32 = vpack.c.bf16 %v2203_v61, %v2202_v60 }
 0x294   :  { %v754_v63 = vrot.slane %v753_v62, 1 }
 0x295   :  { %2590 = vmatpush3.bf16.msra.mxu1 %v2589_v32 }
 0x296   :  { %v755_v0 = vmax.f32 %v753_v62, %v754_v63  ;;  %v941_v62 = vld [vmem:[%s3905_s10 + $0x10] sm:$0xff]  ;;  %2591 = vmatprep.subr.bf16.mxu1 %v3008_v1 }
 0x298   :  { %v756_v3 = vsub.f32 %v744_v50, %v755_v0  ;;  %v757_v55 = vsub.f32 %v745_v56, %v755_v0  ;;  %v811_v50 = vsub.s32 5, %v3507_v54  ;;  %v942_v54 = vld [vmem:[%s3905_s10 + $0x18] sm:$0xff] }
 0x29a   :  { %v758_v4 = vmul.f32 1.442695, %v756_v3  ;;  %v760_v5 = vmul.f32 1.442695, %v757_v55  ;;  %v2556_v3 = vpack.c.bf16 %v942_v54, %v941_v62  ;;  %v2204_v55 = vld [vmem:[%s3905_s10 + $0x50] sm:$0xff] }
 0x29c   :  { %2713 = vpow2.f32 %v758_v4  ;;  %v2205_v4 = vld [vmem:[%s3905_s10 + $0x58] sm:$0xff]  ;;  %2557 = vmatpush3.bf16.msra.mxu0 %v2556_v3 }
 0x29d   :  { %2715 = vpow2.f32 %v760_v5  ;;  %v2592_v5 = vpack.c.bf16 %v2205_v4, %v2204_v55  ;;  %2558 = vmatprep.subr.bf16.mxu0 %v3008_v1 }
 0x29f   :  { %2593 = vmatpush3.bf16.msra.mxu1 %v2592_v5 }
 0x2a0   :  { %2594 = vmatprep.subr.bf16.mxu1 %v3008_v1 }
 0x2a6   :  { %v2714_v6 = vpop.eup %2713 }
 0x2a7   :  { %v2716_v7 = vpop.eup %2715  ;;  %v762_v8 = vsel %vm746_vm11, %v2714_v6, 0.0 }
 0x2a8   :  { %v763_v9 = vsel %vm746_vm11, %v2716_v7, 0.0 }
 0x2a9   :  { %v764_v10 = vadd.f32 %v763_v9, %v762_v8 }
 0x2ab   :  { %v765_v11 = vrot.slane %v764_v10, 4 }
 0x2ad   :  { %v766_v12 = vadd.f32 %v765_v11, %v764_v10  ;;  %v3585_v10 = vld [vmem:[%s3907_s2] sm:$0xff] }
 0x2ae   :  { %2380 = vmatmul.mubr.msk.f32.vlgmr.msra.gmra.mrb[2].mxu0 %vm240_vm1, %v3585_v10  ;;  %2446 = vmatmul.mubr.msk.f32.vlgmr.msra.gmra.mrb[16].mxu1 %vm240_vm1, %v3585_v10 }
 0x2af   :  { %v767_v13 = vrot.slane %v766_v12, 2  ;;  %2390 = vmatprep.mubr.msk.f32.mxu0 %vm3009_vm0, %v3010_v2  ;;  %2456 = vmatprep.mubr.msk.f32.mxu1 %vm3009_vm0, %v3010_v2 }
 0x2b1   :  { %v768_v15 = vadd.f32 %v767_v13, %v766_v12  ;;  %v2198_v12 = vld [vmem:[%s3906_s21 + $0x40] sm:$0xff]  ;;  %v2199_v13 = vld [vmem:[%s3906_s21 + $0x48] sm:$0xff] }
 0x2b3   :  { %v769_v33 = vrot.slane %v768_v15, 1 }
 0x2b5   :  { %v770_v35 = vadd.f32 %v769_v33, %v768_v15  ;;  %v2595_v15 = vpack.c.bf16 %v2199_v13, %v2198_v12  ;;  %v937_v33 = vld [vmem:[%s3906_s21 + $0x10] sm:$0xff] }
 0x2b7   :  { %2717 = vrcp.f32 %v770_v35  ;;  %v938_v35 = vld [vmem:[%s3906_s21 + $0x18] sm:$0xff]  ;;  %2596 = vmatpush3.bf16.msra.mxu1 %v2595_v15 }
 0x2b8   :  { %2597 = vmatprep.subr.bf16.mxu1 %v3008_v1 }
 0x2c1   :  { %v2718_v37 = vpop.eup %2717 }
 0x2c2   :  { %v772_v38 = vmul.f32 %v2718_v37, %v2714_v6  ;;  %v3541_v47 = vmul.f32 %v2718_v37, %v2716_v7  ;;  %v935_v6 = vld [vmem:[%s3906_s21] sm:$0xff]  ;;  %v936_v7 = vld [vmem:[%s3906_s21 + $0x8] sm:$0xff]  ;;  %v2562_v37 = vpack.c.bf16 %v938_v35, %v937_v33 }
 0x2c3   :  { %v2559_v11 = vpack.c.bf16 %v936_v7, %v935_v6 }
 0x2c4   :  { %v784_v39 = vrot.slane %v772_v38, %v783_v34  ;;  %v777_v40 = vrot.slane %v772_v38, %v776_v36  ;;  %v791_v43 = vrot.slane %v772_v38, %v790_v41  ;;  %v805_v44 = vrot.slane %v772_v38, %v804_v42 }
 0x2c5   :  { %v798_v48 = vrot.slane %v772_v38, %v797_v45  ;;  %v819_v49 = vrot.slane %v772_v38, %v818_v46  ;;  %v812_v56 = vrot.slane %v772_v38, %v811_v50  ;;  %v833_v57 = vrot.slane %v3541_v47, %v776_v36  ;;  %2560 = vmatpush3.bf16.msra.mxu0 %v2559_v11 }
 0x2c6   :  { %786 = vbcast.lane.b32.xlu1 %v784_v39, 256  ;;  %779 = vbcast.lane.b32.xlu0 %v777_v40, 256  ;;  %v826_v63 = vrot.slane %v772_v38, %v825_v58  ;;  %v847_v0 = vrot.slane %v3541_v47, %v790_v41  ;;  %v840_v8 = vrot.slane %v3541_v47, %v783_v34  ;;  %v2200_v38 = vld [vmem:[%s3906_s21 + $0x50] sm:$0xff]  ;;  %v2201_v39 = vld [vmem:[%s3906_s21 + $0x58] sm:$0xff] }
 0x2c7   :  { %v861_v9 = vrot.slane %v3541_v47, %v804_v42  ;;  %v854_v34 = vrot.slane %v3541_v47, %v797_v45  ;;  %v875_v36 = vrot.slane %v3541_v47, %v818_v46  ;;  %2561 = vmatprep.subr.bf16.mxu0 %v3008_v1  ;;  %v2598_v40 = vpack.c.bf16 %v2201_v39, %v2200_v38 }
 0x2c8   :  { %v868_v41 = vrot.slane %v3541_v47, %v811_v50  ;;  %v882_v42 = vrot.slane %v3541_v47, %v825_v58 }
 0x2c9   :  { %2563 = vmatpush3.bf16.msra.mxu0 %v2562_v37  ;;  %2599 = vmatpush3.bf16.msra.mxu1 %v2598_v40 }
 0x2ca   :  { %793 = vbcast.lane.b32.xlu1 %v791_v43, 256  ;;  %807 = vbcast.lane.b32.xlu0 %v805_v44, 256  ;;  %v934_v43 = vld [vmem:[%s3908_s1] sm:$0xff]  ;;  %v3011_v44 = vmov 0   ;;  %s2132_s1 = sshll.u32 %s3013_s25, 4  ;;  %s2133_s1 = int_to_ptr.vmem [resolvable:$true] %s2132_s1 }
 0x2cb   :  { %2564 = vmatprep.subr.bf16.mxu0 %v3008_v1  ;;  %2600 = vmatprep.subr.bf16.mxu1 %v3008_v1  ;;  %s2960_s9 = scalar_lea.vmem %s2133_s1, 128  ;;  %p2965_p11 = scmp.lt.s32.totalorder %s2133_s1, %s2133_s1 }
 0x2cc   :  { %2680 = vset.pattern.permute.xlu0 %v3011_v44  ;;  %p2961_p10 = scmp.ne.s32.totalorder %s2133_s1, %s2960_s9  ;;  %p2966_p12 = scmp.lt.s32.totalorder %s2960_s9, %s2960_s9 }
 0x2ce   :  { %800 = vbcast.lane.b32.xlu1 %v798_v48, 256  ;;  %821 = vbcast.lane.b32.xlu0 %v819_v49, 256  ;;  %p2967_p13 = por %p2966_p12, %p2965_p11 }
 0x2d0   :  { %p2968_p0 = pnand %p2967_p13, %p2961_p10 }
 0x2d2   :  { %814 = vbcast.lane.b32.xlu1 %v812_v56, 256  ;;  %835 = vbcast.lane.b32.xlu0 %v833_v57, 256 }
 0x2d6   :  { %828 = vbcast.lane.b32.xlu1 %v826_v63, 256  ;;  %849 = vbcast.lane.b32.xlu0 %v847_v0, 256 }
 0x2da   :  { %842 = vbcast.lane.b32.xlu1 %v840_v8, 256  ;;  %863 = vbcast.lane.b32.xlu0 %v861_v9, 256 }
 0x2de   :  { %856 = vbcast.lane.b32.xlu1 %v854_v34, 256  ;;  %877 = vbcast.lane.b32.xlu0 %v875_v36, 256 }
 0x2e2   :  { %870 = vbcast.lane.b32.xlu1 %v868_v41, 256  ;;  %1092 = vperm.xlu0 %2680, %v934_v43  }
 0x2e6   :  { %884 = vbcast.lane.b32.xlu1 %v882_v42, 256 }
 0x338   :  { %v787_v45 = vpop.permute.xlu1 %786  ;;  %v780_v46 = vpop.permute.xlu0 %779 }
 0x339   :  { %v887_v48 = vmul.f32 %v787_v45, %v3319_v17  ;;  %v886_v49 = vmul.f32 %v780_v46, %v3306_v14 }
 0x33b   :  { %v903_v52 = vsel %vm240_vm1, %v887_v48, 0.0  ;;  %v902_v47 = vsel %vm240_vm1, %v886_v49, 0.0 }
 0x33c   :  { %v794_v50 = vpop.permute.xlu1 %793  ;;  %v808_v51 = vpop.permute.xlu0 %807  ;;  %v904_v58 = vadd.f32 %v903_v52, %v902_v47  ;;  %v1628_v52 = vld [vmem:[#allocation11 + $0x40] sm:$0xff]  ;;  %v1629_v47 = vld [vmem:[#allocation11 + $0x48] sm:$0xff] }
 0x33d   :  { %v888_v56 = vmul.f32 %v794_v50, %v3324_v18  ;;  %v890_v61 = vmul.f32 %v808_v51, %v3344_v20  ;;  %v1112_v50 = vld [vmem:[#allocation11 + $0x8] sm:$0xff] }
 0x33f   :  { %v905_v57 = vsel %vm240_vm1, %v888_v56, 0.0  ;;  %v909_v0 = vsel %vm240_vm1, %v890_v61, 0.0  ;;  %v1630_v61 = vld [vmem:[#allocation11 + $0x50] sm:$0xff] }
 0x340   :  { %v801_v59 = vpop.permute.xlu1 %800  ;;  %v822_v60 = vpop.permute.xlu0 %821  ;;  %v906_v17 = vadd.f32 %v905_v57, %v904_v58 }
 0x341   :  { %v889_v32 = vmul.f32 %v801_v59, %v3337_v19  ;;  %v892_v3 = vmul.f32 %v822_v60, %v3358_v22  ;;  %v1113_v59 = vld [vmem:[#allocation11 + $0x10] sm:$0xff]  ;;  %v2601_v60 = vpack.c.bf16 %v1629_v47, %v1628_v52 }
 0x342   :  { %v2195_v47 = vld [vmem:[%s3861_s16 + $0x1] ss:$0 sm:$0xff] }
 0x343   :  { %v907_v14 = vsel %vm240_vm1, %v889_v32, 0.0  ;;  %v913_v19 = vsel %vm240_vm1, %v892_v3, 0.0  ;;  %v1631_v32 = vld [vmem:[#allocation11 + $0x58] sm:$0xff] }
 0x344   :  { %v908_v62 = vadd.f32 %v907_v14, %v906_v17  ;;  %v815_v54 = vpop.permute.xlu1 %814  ;;  %v836_v63 = vpop.permute.xlu0 %835  ;;  %v2185_v14 = vld [vmem:[%s3905_s10 + $0x28] sm:$0xff] }
 0x345   :  { %v891_v18 = vmul.f32 %v815_v54, %v3353_v21  ;;  %v894_v7 = vmul.f32 %v836_v63, %v3372_v24  ;;  %v2186_v63 = vld [vmem:[%s3905_s10 + $0x30] sm:$0xff] }
 0x346   :  { %v910_v55 = vadd.f32 %v909_v0, %v908_v62  ;;  %v2604_v62 = vpack.c.bf16 %v1631_v32, %v1630_v61  ;;  %v2187_v0 = vld [vmem:[%s3905_s10 + $0x38] sm:$0xff]  ;;  %v2211_v32 = vld [vmem:[%s3859_s14 + $0x2] ss:$0 sm:$0xff] }
 0x347   :  { %v911_v4 = vsel %vm240_vm1, %v891_v18, 0.0  ;;  %v917_v21 = vsel %vm240_vm1, %v894_v7, 0.0  ;;  %v2574_v3 = vpack.c.bf16 %v2187_v0, %v2186_v63  ;;  %v2180_v18 = vld [vmem:[%s3906_s21 + $0x20] sm:$0xff] }
 0x348   :  { %v912_v5 = vadd.f32 %v911_v4, %v910_v55  ;;  %v829_v6 = vpop.permute.xlu1 %828  ;;  %v850_v20 = vpop.permute.xlu0 %849  ;;  %v2181_v55 = vld [vmem:[%s3906_s21 + $0x28] sm:$0xff]  ;;  %v1370_v7 = vld [vmem:[#allocation11 + $0x28] sm:$0xff] }
 0x349   :  { %v893_v8 = vmul.f32 %v829_v6, %v3367_v23  ;;  %v896_v15 = vmul.f32 %v850_v20, %v3386_v26  ;;  %v2577_v4 = vpack.c.bf16 %v2181_v55, %v2180_v18  ;;  %v2183_v6 = vld [vmem:[%s3906_s21 + $0x38] sm:$0xff] }
 0x34a   :  { %v914_v9 = vadd.f32 %v913_v19, %v912_v5  ;;  %v2182_v5 = vld [vmem:[%s3906_s21 + $0x30] sm:$0xff] }
 0x34b   :  { %v915_v11 = vsel %vm240_vm1, %v893_v8, 0.0  ;;  %v921_v24 = vsel %vm240_vm1, %v896_v15, 0.0  ;;  %v2580_v20 = vpack.c.bf16 %v2183_v6, %v2182_v5  ;;  %v1369_v19 = vld [vmem:[#allocation11 + $0x20] sm:$0xff] }
 0x34c   :  { %v916_v12 = vadd.f32 %v915_v11, %v914_v9  ;;  %v843_v13 = vpop.permute.xlu1 %842  ;;  %v864_v22 = vpop.permute.xlu0 %863  ;;  %v2583_v8 = vpack.c.bf16 %v1370_v7, %v1369_v19  ;;  %v1371_v9 = vld [vmem:[#allocation11 + $0x30] sm:$0xff]  ;;  %v1372_v11 = vld [vmem:[#allocation11 + $0x38] sm:$0xff]  ;;  %v1930_v55 = vld [vmem:[#allocation15] sm:$0xff] }
 0x34d   :  { %v895_v33 = vmul.f32 %v843_v13, %v3381_v25  ;;  %v898_v23 = vmul.f32 %v864_v22, %v3400_v28  ;;  %v1111_v28 = vld [vmem:[#allocation11] sm:$0xff] }
 0x34e   :  { %v918_v35 = vadd.f32 %v917_v21, %v916_v12  ;;  %v2565_v58 = vpack.c.bf16 %v1112_v50, %v1111_v28  ;;  %v2586_v12 = vpack.c.bf16 %v1372_v11, %v1371_v9  ;;  %v1718_v22 = vld [vmem:[#allocation12] sm:$0xff]  ;;  %v1719_v21 = vld [vmem:[#allocation12 + $0x8] sm:$0xff]  ;;  %v1932_v9 = vld [vmem:[#allocation15 + $0x10] sm:$0xff] }
 0x34f   :  { %v919_v34 = vsel %vm240_vm1, %v895_v33, 0.0  ;;  %v925_v26 = vsel %vm240_vm1, %v898_v23, 0.0  ;;  %v2607_v15 = vpack.c.bf16 %v1719_v21, %v1718_v22  ;;  %v1720_v33 = vld [vmem:[#allocation12 + $0x10] sm:$0xff]  ;;  %v1933_v11 = vld [vmem:[#allocation15 + $0x18] sm:$0xff] }
 0x350   :  { %v920_v36 = vadd.f32 %v919_v34, %v918_v35  ;;  %v857_v37 = vpop.permute.xlu1 %856  ;;  %v878_v40 = vpop.permute.xlu0 %877  ;;  %v1721_v35 = vld [vmem:[#allocation12 + $0x18] sm:$0xff] }
 0x351   :  { %v897_v38 = vmul.f32 %v857_v37, %v3395_v27  ;;  %v900_v25 = vmul.f32 %v878_v40, %v3414_v30  ;;  %v2610_v34 = vpack.c.bf16 %v1721_v35, %v1720_v33 }
 0x352   :  { %v922_v39 = vadd.f32 %v921_v24, %v920_v36  ;;  %v2176_v24 = vld [vmem:[%s3859_s14] ss:$0 sm:$0xff] }
 0x353   :  { %v923_v41 = vsel %vm240_vm1, %v897_v38, 0.0  ;;  %v929_v27 = vsel %vm240_vm1, %v900_v25, 0.0 }
 0x354   :  { %v924_v42 = vadd.f32 %v923_v41, %v922_v39  ;;  %v871_v43 = vpop.permute.xlu1 %870  ;;  %v2177_v41 = vld [vmem:[%s3861_s16] ss:$0 sm:$0xff] }
 0x355   :  { %v899_v44 = vmul.f32 %v871_v43, %v3409_v29  ;;  %v1114_v29 = vld [vmem:[#allocation11 + $0x18] sm:$0xff] }
 0x356   :  { %v926_v45 = vadd.f32 %v925_v26, %v924_v42  ;;  %v2568_v17 = vpack.c.bf16 %v1114_v29, %v1113_v59 }
 0x357   :  { %v927_v46 = vsel %vm240_vm1, %v899_v44, 0.0 }
 0x358   :  { %v928_v48 = vadd.f32 %v927_v46, %v926_v45  ;;  %v885_v49 = vpop.permute.xlu1 %884 }
 0x359   :  { %v901_v51 = vmul.f32 %v885_v49, %v3423_v31  ;;  %v2184_v31 = vld [vmem:[%s3905_s10 + $0x20] sm:$0xff] }
 0x35a   :  { %v930_v56 = vadd.f32 %v929_v27, %v928_v48  ;;  %v2571_v54 = vpack.c.bf16 %v2185_v14, %v2184_v31  ;;  %v2191_v48 = vld [vmem:[%s3858_s13 + $0x1] ss:$0 sm:$0xff] }
 0x35b   :  { %v931_v57 = vsel %vm240_vm1, %v901_v51, 0.0  ;;  %v2193_v27 = vld [vmem:[%s3859_s14 + $0x1] ss:$0 sm:$0xff]  ;;  %v2209_v51 = vld [vmem:[%s3858_s13 + $0x2] ss:$0 sm:$0xff] }
 0x35c   :  { %v932_v30 = vadd.f32 %v931_v57, %v930_v56  ;;  %v2213_v57 = vld [vmem:[%s3861_s16 + $0x2] ss:$0 sm:$0xff] }
 0x35e   :  { %2391 = vmatmul.mubr.msk.f32.vlgmr.msra.gmra.mrb[2].mxu0 %vm240_vm1, %v932_v30  ;;  %2457 = vmatmul.mubr.msk.f32.vlgmr.msra.gmra.mrb[18].mxu1 %vm240_vm1, %v932_v30 }
 0x35f   :  { %2566 = vmatpush3.bf16.msra.mxu0 %v2565_v58  ;;  %2401 = vmatprep.mubr.msk.f32.mxu0 %vm3009_vm0, %v3010_v2 }
 0x360   :  { %2567 = vmatprep.subr.bf16.mxu0 %v3008_v1  ;;  %2602 = vmatpush3.bf16.msra.mxu1 %v2601_v60 }
 0x361   :  { %2603 = vmatprep.subr.bf16.mxu1 %v3008_v1  ;;  %2467 = vmatprep.mubr.msk.f32.mxu1 %vm3009_vm0, %v3010_v2  ;;  %v1093_v36 = vpop.permute.xlu0 %1092 }
 0x362   :  { %v1357_v28 = vmul.f32 %v2191_v48, %v1093_v36  ;;  %v1616_v56 = vmul.f32 %v2209_v51, %v1093_v36  ;;  %v1841_v48 = vld [vmem:[%s3864_s19 + $0x8] sm:$0xff]  ;;  %v1844_v51 = vld [vmem:[%s3864_s19 + $0x20] sm:$0xff] }
 0x363   :  { %2569 = vmatpush3.bf16.msra.mxu0 %v2568_v17 }
 0x364   :  { %2570 = vmatprep.subr.bf16.mxu0 %v3008_v1  ;;  %2605 = vmatpush3.bf16.msra.mxu1 %v2604_v62  ;;  %v2651_v52 = vadd.f32 %v2193_v27, %v1357_v28 }
 0x365   :  { %2612 = vmatprep.subr.bf16.mxu1 %v3008_v1 }
 0x366   :  { %2402 = vmatmul.mubr.msk.f32.vlgmr.msra.gmra.mrb[2].mxu0 %vm240_vm1, %v3314_v16  ;;  %v2652_v58 = vadd.f32 %v2651_v52, %v2195_v47  ;;  %v1845_v52 = vld [vmem:[%s3864_s19 + $0x28] sm:$0xff] }
 0x367   :  { %2572 = vmatpush3.bf16.msra.mxu0 %v2571_v54  ;;  %2412 = vmatprep.mubr.msk.f32.mxu0 %vm3009_vm0, %v3010_v2  ;;  %v2619_v47 = vpack.c.bf16 %v1845_v52, %v1844_v51 }
 0x368   :  { %2573 = vmatprep.subr.bf16.mxu0 %v3008_v1  ;;  %2468 = vmatmul.mubr.msk.f32.vlgmr.msra.gmra.mrb[20].mxu1 %vm240_vm1, %v3314_v16 }
 0x369   :  { %2513 = vmatprep.mubr.msk.f32.mxu1 %vm3009_vm0, %v3010_v2 }
 0x36b   :  { %2575 = vmatpush3.bf16.msra.mxu0 %v2574_v3 }
 0x36c   :  { %2576 = vmatprep.subr.bf16.mxu0 %v3008_v1 }
 0x36e   :  { %2413 = vmatmul.mubr.msk.f32.vlgmr.msra.gmra.mrb[4].mxu0 %vm240_vm1, %v3585_v10 }
 0x36f   :  { %2578 = vmatpush3.bf16.msra.mxu0 %v2577_v4  ;;  %2423 = vmatprep.mubr.msk.f32.mxu0 %vm3009_vm0, %v3010_v2  ;;  %v1931_v4 = vld [vmem:[#allocation15 + $0x8] sm:$0xff] }
 0x370   :  { %2579 = vmatprep.subr.bf16.mxu0 %v3008_v1  ;;  %v2637_v7 = vpack.c.bf16 %v1931_v4, %v1930_v55  ;;  %v1926_v4 = vld [vmem:[#allocation14] sm:$0xff] }
 0x373   :  { %2581 = vmatpush3.bf16.msra.mxu0 %v2580_v20  ;;  %v2739_v20 = vld [vmem:[%s3901_s7] sm:$0xff] }
 0x374   :  { %2582 = vmatprep.subr.bf16.mxu0 %v3008_v1 }
 0x376   :  { %2424 = vmatmul.mubr.msk.f32.vlgmr.msra.gmra.mrb[4].mxu0 %vm240_vm1, %v932_v30 }
 0x377   :  { %2584 = vmatpush3.bf16.msra.mxu0 %v2583_v8  ;;  %2434 = vmatprep.mubr.msk.f32.mxu0 %vm3009_vm0, %v3010_v2 }
 0x378   :  { %2585 = vmatprep.subr.bf16.mxu0 %v3008_v1 }
 0x37b   :  { %2587 = vmatpush3.bf16.msra.mxu0 %v2586_v12  ;;  %v2640_v12 = vpack.c.bf16 %v1933_v11, %v1932_v9 }
 0x37c   :  { %2606 = vmatprep.subr.bf16.mxu0 %v3008_v1 }
 0x37e   :  { %2435 = vmatmul.mubr.msk.f32.vlgmr.msra.gmra.mrb[4].mxu0 %vm240_vm1, %v3314_v16  ;;  %v2175_v16 = vld [vmem:[%s3858_s13] ss:$0 sm:$0xff] }
 0x37f   :  { %2478 = vmatprep.mubr.msk.f32.mxu0 %vm3009_vm0, %v3010_v2  ;;  %2608 = vmatpush3.bf16.msra.mxu0 %v2607_v15  ;;  %v1101_v37 = vmul.f32 %v2175_v16, %v1093_v36  ;;  %v1807_v36 = vld [vmem:[#allocation3] sm:$0xff] }
 0x380   :  { %2609 = vmatprep.subr.bf16.mxu0 %v3008_v1 }
 0x381   :  { %v1534_v10 = vpop.f32.mrb[16].mxu1  ;;  %v2648_v40 = vadd.f32 %v2176_v24, %v1101_v37 }
 0x382   :  { %v2447_v13 = vpop.f32.mrb[17].mxu1 }
 0x383   :  { %2611 = vmatpush3.bf16.msra.mxu0 %v2610_v34  ;;  %v2649_v42 = vadd.f32 %v2648_v40, %v2177_v41 }
 0x384   :  { %2636 = vmatprep.subr.bf16.mxu0 %v3008_v1 }
 0x431   :  { %v1604_v23 = vpop.f32.mrb[18].mxu1 }
 0x432   :  { %v1605_v38 = vadd.f32 %v1604_v23, %v1534_v10  ;;  %v2458_v39 = vpop.f32.mrb[19].mxu1  ;;  %v2215_v10 = vld [vmem:[%s3863_s18] ss:$0 sm:$0xff] }
 0x434   :  { %v1617_v59 = vadd.f32 %v1616_v56, %v1605_v38  ;;  %v1846_v56 = vld [vmem:[%s3864_s19 + $0x30] sm:$0xff] }
 0x436   :  { %v1626_v14 = vadd.f32 %v2211_v32, %v1617_v59  ;;  %v1849_v59 = vld [vmem:[%s3864_s19 + $0x48] sm:$0xff] }
 0x439   :  { %v1188_v43 = vpop.f32.mrb[2].mxu0 }
 0x43a   :  { %v2650_v26 = vadd.f32 %v2649_v42, %v1188_v43  ;;  %v2403_v25 = vpop.f32.mrb[3].mxu0 }
 0x43b   :  { %v1706_v44 = vpop.f32.mrb[20].mxu1 }
 0x43c   :  { %v2179_v45 = vmul.f32 -1.442695, %v2650_v26  ;;  %v2469_v46 = vpop.f32.mrb[21].mxu1  ;;  %v1707_v61 = vadd.f32 %v2213_v57, %v1706_v44  ;;  %v1847_v57 = vld [vmem:[%s3864_s19 + $0x38] sm:$0xff] }
 0x43d   :  { %v1840_v46 = vld [vmem:[%s3864_s19] sm:$0xff] }
 0x43e   :  { %2719 = vpow2.f32 %v2179_v45  ;;  %v2613_v28 = vpack.c.bf16 %v1841_v48, %v1840_v46 }
 0x440   :  { %2614 = vmatpush3.bf16.msra.mxu1 %v2613_v28 }
 0x441   :  { %2615 = vmatprep.subr.bf16.mxu1 %v3008_v1 }
 0x448   :  { %v2720_v49 = vpop.eup %2719 }
 0x449   :  { %v1196_v50 = vadd.f32 1.0, %v2720_v49  ;;  %v1842_v49 = vld [vmem:[%s3864_s19 + $0x10] sm:$0xff] }
 0x44b   :  { %2721 = vrcp.f32 %v1196_v50  ;;  %v1843_v50 = vld [vmem:[%s3864_s19 + $0x18] sm:$0xff] }
 0x44c   :  { %v2616_v27 = vpack.c.bf16 %v1843_v50, %v1842_v49 }
 0x44e   :  { %2617 = vmatpush3.bf16.msra.mxu1 %v2616_v27 }
 0x44f   :  { %2618 = vmatprep.subr.bf16.mxu1 %v3008_v1 }
 0x451   :  { %v1447_v30 = vpop.f32.mrb[4].mxu0 }
 0x452   :  { %v2653_v29 = vadd.f32 %v2652_v58, %v1447_v30  ;;  %v2436_v60 = vpop.f32.mrb[5].mxu0  ;;  %2620 = vmatpush3.bf16.msra.mxu1 %v2619_v47  ;;  %v2622_v58 = vpack.c.bf16 %v1847_v57, %v1846_v56  ;;  %v1848_v30 = vld [vmem:[%s3864_s19 + $0x40] sm:$0xff] }
 0x453   :  { %2621 = vmatprep.subr.bf16.mxu1 %v3008_v1  ;;  %v1850_v60 = vld [vmem:[%s3864_s19 + $0x50] sm:$0xff] }
 0x454   :  { %v2197_v17 = vmul.f32 -1.442695, %v2653_v29  ;;  %v2625_v29 = vpack.c.bf16 %v1849_v59, %v1848_v30 }
 0x455   :  { %v2722_v31 = vpop.eup %2721 }
 0x456   :  { %2723 = vpow2.f32 %v2197_v17  ;;  %v1710_v62 = vmul.f32 %v2722_v31, %v1707_v61  ;;  %2623 = vmatpush3.bf16.msra.mxu1 %v2622_v58  ;;  %v1851_v61 = vld [vmem:[%s3864_s19 + $0x58] sm:$0xff]  ;;  %v1852_v17 = vld [vmem:[%s3864_s19 + $0x60] sm:$0xff]  ;;  %v1853_v31 = vld [vmem:[%s3864_s19 + $0x68] sm:$0xff] }
 0x457   :  { %2624 = vmatprep.subr.bf16.mxu1 %v3008_v1  ;;  %v2628_v32 = vpack.c.bf16 %v1851_v61, %v1850_v60 }
 0x458   :  { %v1711_v54 = vadd.f32 %v1710_v62, %v1626_v14  ;;  %v2631_v14 = vpack.c.bf16 %v1853_v31, %v1852_v17 }
 0x45a   :  { %2626 = vmatpush3.bf16.msra.mxu1 %v2625_v29 }
 0x45b   :  { %2627 = vmatprep.subr.bf16.mxu1 %v3008_v1 }
 0x45e   :  { %2629 = vmatpush3.bf16.msra.mxu1 %v2628_v32 }
 0x45f   :  { %2630 = vmatprep.subr.bf16.mxu1 %v3008_v1 }
 0x460   :  { %v2724_v63 = vpop.eup %2723 }
 0x461   :  { %v1455_v0 = vadd.f32 1.0, %v2724_v63 }
 0x462   :  { %2632 = vmatpush3.bf16.msra.mxu1 %v2631_v14 }
 0x463   :  { %2725 = vrcp.f32 %v1455_v0  ;;  %2633 = vmatprep.subr.bf16.mxu1 %v3008_v1 }
 0x464   :  { %2727 = vtanh.f32 %v1711_v54 }
 0x46d   :  { %v2726_v3 = vpop.eup %2725 }
 0x46e   :  { %v1713_v18 = vsub.f32 1.0, %v2726_v3  ;;  %v2728_v5 = vpop.eup %2727  ;;  %v1715_v19 = vmul.f32 %v2739_v20, %v2726_v3  ;;  %v1854_v3 = vld [vmem:[%s3864_s19 + $0x70] sm:$0xff] }
 0x470   :  { %v1714_v6 = vmul.f32 %v2728_v5, %v1713_v18  ;;  %v1855_v18 = vld [vmem:[%s3864_s19 + $0x78] sm:$0xff] }
 0x471   :  { %v2634_v55 = vpack.c.bf16 %v1855_v18, %v1854_v3  ;;  %v1927_v5 = vld [vmem:[#allocation14 + $0x8] sm:$0xff] }
 0x472   :  { %v1716_v8 = vadd.f32 %v1715_v19, %v1714_v6  ;;  %v1928_v6 = vld [vmem:[#allocation14 + $0x10] sm:$0xff]  ;;  %v2643_v20 = vpack.c.bf16 %v1927_v5, %v1926_v4  ;;  %v1929_v19 = vld [vmem:[#allocation14 + $0x18] sm:$0xff] }
 0x473   :  { %2635 = vmatpush3.bf16.msra.mxu1 %v2634_v55 }
 0x474   :  { %1717 = vst.msk [vmem:[%s3873_s28] sm:$0xff] %vm240_vm1, %v1716_v8  ;;  %2479 = vmatmul.mubr.msk.f32.vlgmr.msra.gmra.mrb[6].mxu0 %vm240_vm1, %v1716_v8 }
 0x475   :  { %2638 = vmatpush3.bf16.msra.mxu0 %v2637_v7  ;;  %2524 = vmatprep.mubr.msk.f32.mxu0 %vm3009_vm0, %v3010_v2  ;;  %v2646_v7 = vpack.c.bf16 %v1929_v19, %v1928_v6 }
 0x476   :  { %2639 = vmatprep.subr.bf16.mxu0 %v3008_v1 }
 0x479   :  { %2641 = vmatpush3.bf16.msra.mxu0 %v2640_v12 }
 0x47a   :  { %2642 = vmatprep.subr.bf16.mxu0 %v3008_v1 }
 0x47c   :  { %2525 = vmatmul.mubr.msk.f32.vlgmr.msra.gmra.mrb[8].mxu0 %vm240_vm1, %v1716_v8 }
 0x47d   :  { %2535 = vmatprep.mubr.msk.f32.mxu0 %vm3009_vm0, %v3010_v2  ;;  %2644 = vmatpush3.bf16.msra.mxu0 %v2643_v20 }
 0x47e   :  { %2645 = vmatprep.subr.bf16.mxu0 %v3008_v1 }
 0x481   :  { %2647 = vmatpush3.bf16.msra.mxu0 %v2646_v7 }
 0x547   :  { %v1798_v13 = vpop.f32.mrb[6].mxu0 }
 0x548   :  { %v1799_v22 = vadd.f32 %v2215_v10, %v1798_v13  ;;  %v2480_v21 = vpop.f32.mrb[7].mxu0  ;;  %v3012_v13 = vmov 1.0  }
 0x54a   :  { %1802 = vmax.xlane.f32.xlu1 %v1799_v22 }
 0x54f   :  { %v3763_v15 = vpop.f32.mrb[8].mxu0 }
 0x550   :  { %v2526_v33 = vpop.f32.mrb[9].mxu0 }
 0x551   :  { %v2097_v33 = vld [vmem:[#allocation6] sm:$0xff] }
 0x5d7   :  { %v1803_v35 = vpop.xlane.xlu1 %1802 }
 0x5d8   :  { %v1804_v34 = vsub.f32 %v1799_v22, %v1803_v35  ;;  %v2223_v35 = vld [vmem:[#allocation18] ss:$0 sm:$0xff] }
 0x5da   :  { %v1805_v16 = vmul.f32 1.442695, %v1804_v34  ;;  %v2105_v34 = vmul.f32 %v2223_v35, %v2097_v33 }
 0x5dc   :  { %2729 = vpow2.f32 %v1805_v16  ;;  %v2106_v16 = vsel %vm746_vm11, %v2105_v34, 0.0 }
 0x5e6   :  { %v2730_v37 = vpop.eup %2729 }
 0x5e7   :  { %v1808_v24 = vmul.f32 %v2730_v37, %v1807_v36  ;;  %v2221_v36 = vld [vmem:[%s3867_s22] ss:$0 sm:$0xff] }
 0x5e9   :  { %1809 = vadd.xlane.f32.xlu0 %v1808_v24 }
 0x676   :  { %v1810_v2 = vpop.xlane.xlu0 %1809 }
 0x677   :  { %v1811_v23 = vadd.f32 1e-06, %v1810_v2  ;;  %v2222_v2 = vld [vmem:[#allocation17] ss:$0 sm:$0xff] }
 0x679   :  { %2731 = vrcp.f32 %v1811_v23 }
 0x683   :  { %v2732_v38 = vpop.eup %2731 }
 0x684   :  { %v1813_v39 = vmul.f32 %v2732_v38, %v1808_v24 }
 0x686   :  { %v1814_v40 = vmax.f32 %v1813_v39, 1e-06 }
 0x688   :  { %v1815_v41 = vmin.f32 %v1814_v40, 1.0 }
 0x68a   :  { %2733 = vlog2.f32 %v1815_v41 }
 0x694   :  { %v2734_v42 = vpop.eup %2733 }
 0x695   :  { %v1817_v43 = vmul.f32 0.6931472, %v2734_v42 }
 0x697   :  { %1819 = vmax.xlane.f32.xlu0 %v1817_v43  ;;  %1818 = vst [vmem:[#allocation20] sm:$0xff] %v1817_v43 }
 0x724   :  { %v1820_v26 = vpop.xlane.xlu0 %1819 }
 0x725   :  { %vm1821_vm12 = vcmp.eq.f32.partialorder %v1817_v43, %v1820_v26 }
 0x726   :  { %v1822_v25 = vsel %vm1821_vm12, %v3505_v53, 128 }
 0x727   :  { %v1824_v44 = vshra.s32 %v1822_v25, 16  ;;  %v1823_v62 = vand.u32 65535, %v1822_v25 }
 0x729   :  { %v1826_v45 = vcvt.s32.f32 %v1824_v44  ;;  %v1825_v63 = vcvt.s32.f32 %v1823_v62 }
 0x72b   :  { %1827 = vmin.xlane.f32.xlu1 %v1826_v45 }
 0x7b8   :  { %v1828_v54 = vpop.xlane.xlu1 %1827 }
 0x7b9   :  { %vm1829_vm13 = vcmp.eq.f32.partialorder %v1826_v45, %v1828_v54  ;;  %v1834_v8 = vcvt.f32.s32 %v1828_v54 }
 0x7ba   :  { %v1830_v0 = vsel %vm1829_vm13, %v1825_v63, inf }
 0x7bb   :  { %1831 = vmin.xlane.f32.xlu0 %v1830_v0  ;;  %v1835_v11 = vshll.u32 %v1834_v8, 16 }
 0x7bf   :  { %2107 = vadd.xlane.f32.xlu0 %v2106_v16 }
 0x848   :  { %v1832_v9 = vpop.xlane.xlu0 %1831 }
 0x849   :  { %v1833_v12 = vcvt.f32.s32 %v1832_v9 }
 0x84b   :  { %v1836_v10 = vadd.s32 %v1835_v11, %v1833_v12 }
 0x84d   :  { %vm1837_vm14 = vcmp.eq.s32.totalorder %v3505_v53, %v1836_v10 }
 0x84e   :  { %2514 = vmatmul.mubr.msk.f32.vlgmr.msra.gmra.mrb[22].mxu1 %vm1837_vm14, %v3012_v13 }
 0x921   :  { %v1922_v22 = vpop.f32.mrb[22].mxu1 }
 0x922   :  { %v2515_v21 = vpop.f32.mrb[23].mxu1  ;;  %2536 = vmatmul.mubr.msk.f32.vlgmr.msra.gmra.mrb[10].mxu0 %vm240_vm1, %v1922_v22 }
 0x9f5   :  { %v2073_v1 = vpop.f32.mrb[10].mxu0 }
 0x9f6   :  { %v2074_v37 = vadd.f32 %v2073_v1, %v3763_v15  ;;  %v2537_v53 = vpop.f32.mrb[11].mxu0 }
 0x9f8   :  { %v2084_v24 = vadd.f32 %v2221_v36, %v2074_v37 }
 0x9fa   :  { %v2085_v23 = vmax.f32 %v2084_v24, 0.0 }
 0x9fc   :  { %v2093_v38 = vmul.f32 %v2222_v2, %v2085_v23 }
 0x9fe   :  { %v2094_v39 = vsel %vm240_vm1, %v2093_v38, 0.0 }
 0x9ff   :  { %2095 = vadd.xlane.f32.xlu1 %v2094_v39 }
 0xa00   :  { %2971 = shalt.err (!%p2968_p0)
}
 0xa01   :  { %s2972_s12 = scalar_lea.hbm %s3871_s26, 128 }
 0xa02   :  { %p2973_p1 = scmp.ne.s32.totalorder %s3871_s26, %s2972_s12  ;;  %p2976_p2 = scmp.lt.u32.totalorder %s2972_s12, %s3871_s26 }
 0xa04   :  { %p2978_p3 = pnand %p2976_p2, %p2973_p1 }
 0xa06   :  { %2981 = shalt.err (!%p2978_p3)
}
 0xa07   :  { %2135 = dma.vmem_to_hbm [thread:$0]  %s2133_s1, 128, %s3871_s26, [#allocation5]   ;;  %v2108_v15 = vpop.xlane.xlu0 %2107  ;;  %v2224_v40 = vld [vmem:[#allocation2] ss:$0 sm:$0xff]  ;;  %vm2124_vm15 = vcmask 7168  }
 0xa8c   :  { %v2096_v41 = vpop.xlane.xlu1 %2095 }
 0xa8d   :  { %v2109_v42 = vadd.f32 %v2108_v15, %v2096_v41 }
 0xa8f   :  { %v2117_v43 = vadd.f32 %v2224_v40, %v2109_v42 }
 0xa91   :  { %v2225_v26 = vmul.f32 -1.442695, %v2117_v43 }
 0xa93   :  { %2735 = vpow2.f32 %v2225_v26 }
 0xa9d   :  { %v2736_v25 = vpop.eup %2735 }
 0xa9e   :  { %v2121_v44 = vadd.f32 1.0, %v2736_v25 }
 0xaa0   :  { %2737 = vrcp.f32 %v2121_v44 }
 0xaaa   :  { %v2738_v45 = vpop.eup %2737 }
 0xaab   :  { %2125 = vst.msk [vmem:[%s3872_s27] sm:$0xff] %vm2124_vm15, %v2738_v45 }
 0xaac   :  { %2994 = dma.done.wait [#allocation5], 128  }
 0xaad   :  { %2995 = vsyncadd [#allocation5], 4294967168 }
 0xaae   :  { %2147 = vsyncpa [#allocation4], 1 }
 0xaaf   :  { %2148 = vsyncpa [#allocation7], 1 }
 0xab0   :  { %2149 = vsyncpa [#allocation10], 1 }
 0xab1   :  { %2150 = vsyncpa [#allocation13], 1 }
 0xab2   :  { %2151 = vsyncpa [#allocation16], 1 }
 0xab3   :  { %2152 = vsyncpa [#allocation19], 1 }
 0xab4   :  { %2153 = vsyncpa [#allocation5], 1 }

</bundles_post_ra>
